<compile_context>
chip_gen: v6e
topology: v6e:2x2x1
jax: 0.10.0
libtpu: 0.0.40
codegen_flags: <defaults>
</compile_context>

<pallas_src>
import functools

import jax
import jax.numpy as jnp
from jax import lax
from jax.experimental import pallas as pl
from jax.experimental.pallas import tpu as pltpu


# ---------------------------------------------------------------------------
# kernel
# ---------------------------------------------------------------------------
def _shift_rows(t, shift):
    """result[r] = t[r - shift]; vacated rows are zero-filled (shift in {+1, -1})."""
    z = jnp.zeros((abs(shift), t.shape[1]), t.dtype)
    if shift > 0:
        return jnp.concatenate([z, t[:-shift, :]], axis=0)
    return jnp.concatenate([t[-shift:, :], z], axis=0)


def _fused_basic_block_kernel(x_ref, w_ref, gamma_ref, beta_ref, out_ref,
                              conv_scr, stats_scr, coef_scr,
                              *, hp, cout, inv_cnt, eps):
    """Two-phase fused BasicBlock.

    x_ref:    (Mb, W*Cin)  Nb stacked H-padded images, lane layout w*Cin + ci
    w_ref:    (3, W*Cin, W*Cout) banded weights (kw taps + width zero-pad folded in)
    gamma/beta_ref: (1, W*Cout) lane-tiled BN affine params
    out_ref:  (Mb, W*Cout) padded-row output (pad rows are discarded by the wrapper)
    conv_scr: (NB, Mb, W*Cout) persistent conv activations (phase 0 -> phase 1)
    stats_scr:(2, W*Cout) running per-lane sum / sum-of-squares
    coef_scr: (2, W*Cout) fused BN scale / shift
    """
    ph = pl.program_id(0)      # 0: conv + stats, 1: BN + residual + ReLU
    b = pl.program_id(1)       # batch-block index

    @pl.when(jnp.logical_and(ph == 0, b == 0))
    def _init_stats():
        stats_scr[...] = jnp.zeros_like(stats_scr)

    @pl.when(ph == 0)
    def _phase0():
        x = x_ref[...]                                                  # (Mb, WCin) f32
        t0 = jnp.dot(x, w_ref[0], preferred_element_type=jnp.float32)
        t1 = jnp.dot(x, w_ref[1], preferred_element_type=jnp.float32)
        t2 = jnp.dot(x, w_ref[2], preferred_element_type=jnp.float32)
        # out[r] = t0[r-1] + t1[r] + t2[r+1] (the H zero-pad rows isolate images).
        conv = _shift_rows(t0, 1) + t1 + _shift_rows(t2, -1)            # (Mb, WCout)
        conv_scr[b] = conv
        out_ref[...] = conv.astype(out_ref.dtype)   # defines the block; phase 1 overwrites

        # per-lane partial sums over interior (non-pad) rows only
        rid = lax.broadcasted_iota(jnp.int32, conv.shape, 0) % hp
        interior = jnp.logical_and(rid != 0, rid != hp - 1)
        cm = jnp.where(interior, conv, 0.0)
        psum = jnp.sum(cm, axis=0, keepdims=True)                       # (1, WCout)
        psq = jnp.sum(cm * conv, axis=0, keepdims=True)                 # (1, WCout)
        stats_scr[...] = stats_scr[...] + jnp.concatenate([psum, psq], axis=0)

    @pl.when(jnp.logical_and(ph == 1, b == 0))
    def _bn_coefficients():
        # Group-sum matmul: lane l = w*Cout + c; G[l, l'] = 1 iff same channel.
        # stats @ G gives the per-channel totals already broadcast over w.
        wc = stats_scr.shape[-1]
        li = lax.broadcasted_iota(jnp.int32, (wc, wc), 0) % cout
        lj = lax.broadcasted_iota(jnp.int32, (wc, wc), 1) % cout
        g = (li == lj).astype(jnp.float32)
        tot = jnp.dot(stats_scr[...], g, preferred_element_type=jnp.float32)  # (2, WC)
        # NOTE: single-pass E[x^2]-E[x]^2 in f32; fine for conv outputs with |mean|<<std.
        mean = tot[0:1, :] * inv_cnt
        var = jnp.maximum(tot[1:2, :] * inv_cnt - mean * mean, 0.0)
        scale = gamma_ref[...] * lax.rsqrt(var + eps)
        shift = beta_ref[...] - mean * scale
        coef_scr[0:1, :] = scale
        coef_scr[1:2, :] = shift

    @pl.when(ph == 1)
    def _phase1():
        conv = conv_scr[b]
        # identity shortcut = the (re-streamed, pipelined) padded input block itself
        y = conv * coef_scr[0:1, :] + coef_scr[1:2, :] + x_ref[...]
        out_ref[...] = jnp.maximum(y, 0.0).astype(out_ref.dtype)


# ---------------------------------------------------------------------------
# wrapper
# ---------------------------------------------------------------------------
def _make_banded_weight(conv_w, width):
    """(Cout, Cin, 3, 3) OIHW -> (3, W*Cin, W*Cout) banded matrices, one per kh tap.

    band[kh, w_in*Cin + ci, w_out*Cout + co] = conv_w[co, ci, kh, w_in - w_out + 1]
    for |w_in - w_out| <= 1 and zero otherwise (folds kw taps + width zero-padding).
    """
    cout, cin = conv_w.shape[0], conv_w.shape[1]
    w_k = jnp.transpose(conv_w, (2, 3, 1, 0)).astype(jnp.float32)   # (kh, kw, Cin, Cout)
    w_in = jnp.arange(width)[:, None]
    w_out = jnp.arange(width)[None, :]
    kw = w_in - w_out + 1                                           # (W, W)
    valid = (kw >= 0) & (kw <= 2)
    band = w_k[:, jnp.clip(kw, 0, 2)]                               # (3, W, W, Cin, Cout)
    band = band * valid[None, :, :, None, None].astype(jnp.float32)
    band = jnp.transpose(band, (0, 1, 3, 2, 4))                     # (3, W, Cin, W, Cout)
    return band.reshape(3, width * cin, width * cout)


def _pick_batch_block(n, hp):
    """Largest divisor Nb of N with Nb*(H+2) a sublane multiple and <= 256 rows."""
    cands = [d for d in range(1, n + 1) if n % d == 0 and (d * hp) % 8 == 0]
    small = [d for d in cands if d * hp <= 256]
    if small:
        return max(small)
    return min(cands) if cands else n   # Nb == n => block equals full array (always legal)


@functools.partial(jax.jit, static_argnames=("eps",))
def basic_block_forward(x_nchw, conv_w, bn_gamma, bn_beta, eps=1e-5):
    """x_nchw: (N, Cin, H, W) f32; conv_w: (Cout, Cin, 3, 3); returns (N, Cout, H, W)."""
    N, Cin, H, W = x_nchw.shape
    Cout = conv_w.shape[0]
    assert Cin == Cout, "identity shortcut path requires in_planes == planes (stride=1)"
    hp = H + 2
    WC_in, WC_out = W * Cin, W * Cout
    f32 = jnp.float32

    # Banded-weight scaling guard: ~18% dense at W=16; footprint 3*(W*Cin)*(W*Cout)*4 B.
    # TODO(synk): im2col-style (H*W, 9*Cin) x (9*Cin, Cout) fallback once W*C grows large.
    assert 3 * WC_in * WC_out * 4 <= (12 << 20), "banded weight too large for VMEM"

    Nb = _pick_batch_block(N, hp)
    NB = N // Nb
    Mb = Nb * hp

    # Single materialized relayout: NCHW -> NHWC -> pad H by 1 -> flat (N*(H+2), W*Cin).
    x_nhwc = jnp.transpose(x_nchw, (0, 2, 3, 1)).astype(f32)
    x_hp = jnp.pad(x_nhwc, ((0, 0), (1, 1), (0, 0), (0, 0))).reshape(N * hp, WC_in)

    w_band = _make_banded_weight(conv_w, W)                         # (3, W*Cin, W*Cout)
    gamma_l = jnp.tile(bn_gamma.astype(f32), W).reshape(1, WC_out)  # lane layout w*Cout+c
    beta_l = jnp.tile(bn_beta.astype(f32), W).reshape(1, WC_out)

    kernel = functools.partial(
        _fused_basic_block_kernel,
        hp=hp, cout=Cout, inv_cnt=1.0 / float(N * H * W), eps=float(eps))

    # VMEM budget derived from actual block/scratch sizes (+headroom), not a flat limit.
    stream_blk = Mb * max(WC_in, WC_out) * 4
    vmem_needed = (2 * 2 * stream_blk                 # x + out blocks, double-buffered
                   + 2 * w_band.size * 4              # resident banded weight
                   + 2 * 2 * 2 * WC_out * 4           # gamma / beta
                   + NB * Mb * WC_out * 4             # conv activation scratch
                   + 2 * 2 * WC_out * 4)              # stats + coef scratch
    vmem_limit = int(min(max(2 * vmem_needed, 8 << 20), 100 << 20))

    flops = 2 * 3 * (N * hp) * WC_in * WC_out + 6 * (N * hp) * WC_out
    bytes_accessed = (2 * x_hp.size * 4 + w_band.size * 4
                      + 2 * (N * hp) * WC_out * 4 + 4 * WC_out * 4)

    out_flat = pl.pallas_call(
        kernel,
        out_shape=jax.ShapeDtypeStruct((N * hp, WC_out), f32),
        grid=(2, NB),                                   # (phase, batch-block)
        in_specs=[
            pl.BlockSpec((Mb, WC_in), lambda ph, b: (b, 0)),
            pl.BlockSpec((3, WC_in, WC_out), lambda ph, b: (0, 0, 0)),   # resident
            pl.BlockSpec((1, WC_out), lambda ph, b: (0, 0)),             # gamma (resident)
            pl.BlockSpec((1, WC_out), lambda ph, b: (0, 0)),             # beta  (resident)
        ],
        out_specs=pl.BlockSpec((Mb, WC_out), lambda ph, b: (b, 0)),
        scratch_shapes=[
            pltpu.VMEM((NB, Mb, WC_out), f32),   # conv activations (phase 0 -> phase 1)
            pltpu.VMEM((2, WC_out), f32),        # running sum / sum-of-squares
            pltpu.VMEM((2, WC_out), f32),        # fused BN scale / shift
        ],
        compiler_params=pltpu.CompilerParams(
            # Both axes "arbitrary": the global-stats accumulator and the phase ordering
            # require sequential execution (see module TODO for the v7x megacore option).
            dimension_semantics=("arbitrary", "arbitrary"),
            vmem_limit_bytes=vmem_limit,
        ),
        cost_estimate=pl.CostEstimate(flops=int(flops), transcendentals=2,
                                      bytes_accessed=int(bytes_accessed)),
    )(x_hp, w_band, gamma_l, beta_l)

    out = out_flat.reshape(N, hp, W, Cout)[:, 1:H + 1]   # drop the H pad rows
    return jnp.transpose(out, (0, 3, 1, 2))


# ---------------------------------------------------------------------------
# reference + test
# ---------------------------------------------------------------------------
def _reference(x_nchw, conv_w, bn_gamma, bn_beta, eps=1e-5):
    """Pure-JAX reference matching PyTorch semantics (training-mode BN)."""
    out = lax.conv_general_dilated(
        x_nchw, conv_w, window_strides=(1, 1), padding=((1, 1), (1, 1)),
        dimension_numbers=("NCHW", "OIHW", "NCHW"))
    mean = jnp.mean(out, axis=(0, 2, 3), keepdims=True)
    var = jnp.mean((out - mean) ** 2, axis=(0, 2, 3), keepdims=True)
    out = (out - mean) * lax.rsqrt(var + eps)
    out = out * bn_gamma.reshape(1, -1, 1, 1) + bn_beta.reshape(1, -1, 1, 1)
    out = out + x_nchw                       # identity shortcut (stride=1)
    return jnp.maximum(out, 0.0)


if __name__ == "__main__":
    key = jax.random.PRNGKey(0)
    k_x, k_w = jax.random.split(key)

    # in_planes = planes = 8, stride = 1, with_BN = True; batch 16 so the batch-blocked
    # grid actually has work to fold into the matmul M dimension (W*C stays 128).
    N, C, H, W = 16, 8, 16, 16
    x = jax.random.normal(k_x, (N, C, H, W), dtype=jnp.float32)

    # Deterministic conv weight init (kaiming-uniform-like bound), no bias (bias=False).
    fan_in = C * 3 * 3
    bound = (1.0 / fan_in) ** 0.5
    conv_w = jax.random.uniform(k_w, (C, C, 3, 3), jnp.float32, -bound, bound)

    # BatchNorm2d defaults: weight = 1, bias = 0.
    bn_gamma = jnp.ones((C,), jnp.float32)
    bn_beta = jnp.zeros((C,), jnp.float32)

    out = basic_block_forward(x, conv_w, bn_gamma, bn_beta)
    out = jax.block_until_ready(out)

    ref = _reference(x, conv_w, bn_gamma, bn_beta)
    assert out.shape == (N, C, H, W)
    err = float(jnp.max(jnp.abs(out - ref)))
    assert jnp.allclose(out, ref, rtol=2e-4, atol=2e-4), err

    print("KERNEL_OK")
</pallas_src>

<mosaic_0001>
module attributes {stable_mosaic.version = 11 : i64} {
  func.func @_fused_basic_block_kernel(%arg0: i32, %arg1: i32, %arg2: memref<144x128xf32, #tpu.memory_space<vmem>>, %arg3: memref<3x128x128xf32, #tpu.memory_space<vmem>>, %arg4: memref<1x128xf32, #tpu.memory_space<vmem>>, %arg5: memref<1x128xf32, #tpu.memory_space<vmem>>, %arg6: memref<144x128xf32, #tpu.memory_space<vmem>>, %arg7: memref<2x144x128xf32, #tpu.memory_space<vmem>>, %arg8: memref<2x128xf32, #tpu.memory_space<vmem>>, %arg9: memref<2x128xf32, #tpu.memory_space<vmem>>) attributes {dimension_semantics = [#tpu.dimension_semantics<arbitrary>, #tpu.dimension_semantics<arbitrary>], iteration_bounds = array<i64: 2, 2>, scalar_prefetch = 0 : i64, scratch_operands = 3 : i64, tpu.core_type = #tpu.core_type<tc>, window_params = [{transform_indices = @transform_0, window_bounds = array<i64: 144, 128>}, {pipeline_mode = #tpu.pipeline_mode<synchronous>, transform_indices = @transform_1, window_bounds = array<i64: 3, 128, 128>}, {pipeline_mode = #tpu.pipeline_mode<synchronous>, transform_indices = @transform_2, window_bounds = array<i64: 1, 128>}, {pipeline_mode = #tpu.pipeline_mode<synchronous>, transform_indices = @transform_3, window_bounds = array<i64: 1, 128>}, {transform_indices = @transform_4, window_bounds = array<i64: 144, 128>}]} {
    %c0_i32 = arith.constant 0 : i32
    %0 = arith.cmpi eq, %arg0, %c0_i32 : i32
    %c0_i32_0 = arith.constant 0 : i32
    %1 = arith.cmpi eq, %arg1, %c0_i32_0 : i32
    %2 = arith.andi %0, %1 : i1
    %3 = arith.extui %2 : i1 to i32
    %c0_i32_1 = arith.constant 0 : i32
    %4 = arith.cmpi ne, %3, %c0_i32_1 : i32
    scf.if %4 {
      %cst = arith.constant 0.000000e+00 : f32
      %16 = vector.broadcast %cst : f32 to vector<2x128xf32>
      %c0 = arith.constant 0 : index
      %c0_8 = arith.constant 0 : index
      %17 = vector.load %arg8[%c0, %c0_8] : memref<2x128xf32, #tpu.memory_space<vmem>>, vector<2x128xf32>
      tpu.vector_store %arg8[%c0, %c0_8], %16 {strides = array<i32>} : memref<2x128xf32, #tpu.memory_space<vmem>>, vector<2x128xf32>,
    } else {
    }
    %c0_i32_2 = arith.constant 0 : i32
    %5 = arith.cmpi eq, %arg0, %c0_i32_2 : i32
    %6 = arith.extui %5 : i1 to i32
    %c0_i32_3 = arith.constant 0 : i32
    %7 = arith.cmpi ne, %6, %c0_i32_3 : i32
    scf.if %7 {
      %c0 = arith.constant 0 : index
      %c0_8 = arith.constant 0 : index
      %16 = vector.load %arg2[%c0, %c0_8] : memref<144x128xf32, #tpu.memory_space<vmem>>, vector<144x128xf32>
      %c0_9 = arith.constant 0 : index
      %c0_10 = arith.constant 0 : index
      %c0_11 = arith.constant 0 : index
      %17 = vector.load %arg3[%c0_9, %c0_10, %c0_11] : memref<3x128x128xf32, #tpu.memory_space<vmem>>, vector<1x128x128xf32>
      %18 = vector.shape_cast %17 : vector<1x128x128xf32> to vector<128x128xf32>
      %cst = arith.constant dense<0.000000e+00> : vector<144x128xf32>
      %19 = tpu.matmul %16, %18, %cst {dimension_numbers = #tpu.dot_dimension_numbers<[1], [0], [0], [1], [0, 0, 1, 1], [], []>} : vector<144x128xf32>, vector<128x128xf32>, vector<144x128xf32> -> vector<144x128xf32>
      %c1 = arith.constant 1 : index
      %c0_12 = arith.constant 0 : index
      %c0_13 = arith.constant 0 : index
      %20 = vector.load %arg3[%c1, %c0_12, %c0_13] : memref<3x128x128xf32, #tpu.memory_space<vmem>>, vector<1x128x128xf32>
      %21 = vector.shape_cast %20 : vector<1x128x128xf32> to vector<128x128xf32>
      %cst_14 = arith.constant dense<0.000000e+00> : vector<144x128xf32>
      %22 = tpu.matmul %16, %21, %cst_14 {dimension_numbers = #tpu.dot_dimension_numbers<[1], [0], [0], [1], [0, 0, 1, 1], [], []>} : vector<144x128xf32>, vector<128x128xf32>, vector<144x128xf32> -> vector<144x128xf32>
      %c2 = arith.constant 2 : index
      %c0_15 = arith.constant 0 : index
      %c0_16 = arith.constant 0 : index
      %23 = vector.load %arg3[%c2, %c0_15, %c0_16] : memref<3x128x128xf32, #tpu.memory_space<vmem>>, vector<1x128x128xf32>
      %24 = vector.shape_cast %23 : vector<1x128x128xf32> to vector<128x128xf32>
      %cst_17 = arith.constant dense<0.000000e+00> : vector<144x128xf32>
      %25 = tpu.matmul %16, %24, %cst_17 {dimension_numbers = #tpu.dot_dimension_numbers<[1], [0], [0], [1], [0, 0, 1, 1], [], []>} : vector<144x128xf32>, vector<128x128xf32>, vector<144x128xf32> -> vector<144x128xf32>
      %cst_18 = arith.constant 0.000000e+00 : f32
      %26 = vector.broadcast %cst_18 : f32 to vector<1x128xf32>
      %27 = vector.extract_strided_slice %19 {offsets = [0, 0], sizes = [143, 128], strides = [1, 1]} : vector<144x128xf32> to vector<143x128xf32>
      %28 = tpu.concatenate %26, %27 in 0 : vector<1x128xf32>, vector<143x128xf32> -> vector<144x128xf32>
      %29 = arith.addf %28, %22 : vector<144x128xf32>
      %cst_19 = arith.constant 0.000000e+00 : f32
      %30 = vector.broadcast %cst_19 : f32 to vector<1x128xf32>
      %31 = vector.extract_strided_slice %25 {offsets = [1, 0], sizes = [143, 128], strides = [1, 1]} : vector<144x128xf32> to vector<143x128xf32>
      %32 = tpu.concatenate %31, %30 in 0 : vector<143x128xf32>, vector<1x128xf32> -> vector<144x128xf32>
      %33 = arith.addf %29, %32 : vector<144x128xf32>
      %34 = arith.index_cast %arg1 : i32 to index
      %c0_20 = arith.constant 0 : index
      %c0_21 = arith.constant 0 : index
      %35 = vector.load %arg7[%34, %c0_20, %c0_21] : memref<2x144x128xf32, #tpu.memory_space<vmem>>, vector<1x144x128xf32>
      %36 = vector.shape_cast %35 : vector<1x144x128xf32> to vector<144x128xf32>
      %37 = vector.shape_cast %33 : vector<144x128xf32> to vector<1x144x128xf32>
      tpu.vector_store %arg7[%34, %c0_20, %c0_21], %37 {strides = array<i32>} : memref<2x144x128xf32, #tpu.memory_space<vmem>>, vector<1x144x128xf32>,
      %c0_22 = arith.constant 0 : index
      %c0_23 = arith.constant 0 : index
      %38 = vector.load %arg6[%c0_22, %c0_23] : memref<144x128xf32, #tpu.memory_space<vmem>>, vector<144x128xf32>
      tpu.vector_store %arg6[%c0_22, %c0_23], %33 {strides = array<i32>} : memref<144x128xf32, #tpu.memory_space<vmem>>, vector<144x128xf32>,
      %39 = tpu.iota {dimensions = array<i32: 0>} : vector<144x128xi32>
      %c18_i32 = arith.constant 18 : i32
      %c0_i32_24 = arith.constant 0 : i32
      %40 = arith.cmpi eq, %c18_i32, %c0_i32_24 : i32
      %c1_i32_25 = arith.constant 1 : i32
      %41 = arith.select %40, %c1_i32_25, %c18_i32 : i32
      %42 = vector.broadcast %41 : i32 to vector<144x128xi32>
      %43 = arith.remsi %39, %42 : vector<144x128xi32>
      %c0_i32_26 = arith.constant 0 : i32
      %44 = vector.broadcast %c0_i32_26 : i32 to vector<144x128xi32>
      %45 = arith.cmpi ne, %43, %44 : vector<144x128xi32>
      %c0_i32_27 = arith.constant 0 : i32
      %46 = vector.broadcast %c0_i32_27 : i32 to vector<144x128xi32>
      %47 = arith.cmpi slt, %43, %46 : vector<144x128xi32>
      %c0_i32_28 = arith.constant 0 : i32
      %48 = arith.cmpi slt, %41, %c0_i32_28 : i32
      %49 = vector.broadcast %48 : i1 to vector<144x128xi1>
      %50 = vector.broadcast %49 : vector<144x128xi1> to vector<144x128xi1>
      %51 = arith.xori %47, %50 : vector<144x128xi1>
      %52 = arith.andi %51, %45 : vector<144x128xi1>
      %53 = vector.broadcast %41 : i32 to vector<144x128xi32>
      %54 = arith.addi %43, %53 : vector<144x128xi32>
      %55 = arith.select %52, %54, %43 : vector<144x128xi1>, vector<144x128xi32>
      %c0_i32_29 = arith.constant 0 : i32
      %56 = vector.broadcast %c0_i32_29 : i32 to vector<144x128xi32>
      %57 = arith.cmpi ne, %55, %56 : vector<144x128xi32>
      %c17_i32 = arith.constant 17 : i32
      %58 = vector.broadcast %c17_i32 : i32 to vector<144x128xi32>
      %59 = arith.cmpi ne, %55, %58 : vector<144x128xi32>
      %60 = arith.andi %57, %59 : vector<144x128xi1>
      %cst_30 = arith.constant 0.000000e+00 : f32
      %61 = vector.broadcast %cst_30 : f32 to vector<144x128xf32>
      %62 = arith.select %60, %33, %61 : vector<144x128xi1>, vector<144x128xf32>
      %cst_31 = arith.constant dense<0.000000e+00> : vector<128xf32>
      %63 = vector.multi_reduction <add>, %62, %cst_31 [0] : vector<144x128xf32> to vector<128xf32>
      %64 = vector.shape_cast %63 : vector<128xf32> to vector<1x128xf32>
      %65 = arith.mulf %62, %33 : vector<144x128xf32>
      %cst_32 = arith.constant dense<0.000000e+00> : vector<128xf32>
      %66 = vector.multi_reduction <add>, %65, %cst_32 [0] : vector<144x128xf32> to vector<128xf32>
      %67 = vector.shape_cast %66 : vector<128xf32> to vector<1x128xf32>
      %c0_33 = arith.constant 0 : index
      %c0_34 = arith.constant 0 : index
      %68 = vector.load %arg8[%c0_33, %c0_34] : memref<2x128xf32, #tpu.memory_space<vmem>>, vector<2x128xf32>
      %69 = tpu.concatenate %64, %67 in 0 : vector<1x128xf32>, vector<1x128xf32> -> vector<2x128xf32>
      %70 = arith.addf %68, %69 : vector<2x128xf32>
      %c0_35 = arith.constant 0 : index
      %c0_36 = arith.constant 0 : index
      %71 = vector.load %arg8[%c0_35, %c0_36] : memref<2x128xf32, #tpu.memory_space<vmem>>, vector<2x128xf32>
      tpu.vector_store %arg8[%c0_35, %c0_36], %70 {strides = array<i32>} : memref<2x128xf32, #tpu.memory_space<vmem>>, vector<2x128xf32>,
    } else {
    }
    %c1_i32 = arith.constant 1 : i32
    %8 = arith.cmpi eq, %arg0, %c1_i32 : i32
    %c0_i32_4 = arith.constant 0 : i32
    %9 = arith.cmpi eq, %arg1, %c0_i32_4 : i32
    %10 = arith.andi %8, %9 : i1
    %11 = arith.extui %10 : i1 to i32
    %c0_i32_5 = arith.constant 0 : i32
    %12 = arith.cmpi ne, %11, %c0_i32_5 : i32
    scf.if %12 {
      %16 = tpu.iota {dimensions = array<i32: 0>} : vector<128x128xi32>
      %c8_i32 = arith.constant 8 : i32
      %c0_i32_8 = arith.constant 0 : i32
      %17 = arith.cmpi eq, %c8_i32, %c0_i32_8 : i32
      %c1_i32_9 = arith.constant 1 : i32
      %18 = arith.select %17, %c1_i32_9, %c8_i32 : i32
      %19 = vector.broadcast %18 : i32 to vector<128x128xi32>
      %20 = arith.remsi %16, %19 : vector<128x128xi32>
      %c0_i32_10 = arith.constant 0 : i32
      %21 = vector.broadcast %c0_i32_10 : i32 to vector<128x128xi32>
      %22 = arith.cmpi ne, %20, %21 : vector<128x128xi32>
      %c0_i32_11 = arith.constant 0 : i32
      %23 = vector.broadcast %c0_i32_11 : i32 to vector<128x128xi32>
      %24 = arith.cmpi slt, %20, %23 : vector<128x128xi32>
      %c0_i32_12 = arith.constant 0 : i32
      %25 = arith.cmpi slt, %18, %c0_i32_12 : i32
      %26 = vector.broadcast %25 : i1 to vector<128x128xi1>
      %27 = vector.broadcast %26 : vector<128x128xi1> to vector<128x128xi1>
      %28 = arith.xori %24, %27 : vector<128x128xi1>
      %29 = arith.andi %28, %22 : vector<128x128xi1>
      %30 = vector.broadcast %18 : i32 to vector<128x128xi32>
      %31 = arith.addi %20, %30 : vector<128x128xi32>
      %32 = arith.select %29, %31, %20 : vector<128x128xi1>, vector<128x128xi32>
      %33 = tpu.iota {dimensions = array<i32: 1>} : vector<128x128xi32>
      %c8_i32_13 = arith.constant 8 : i32
      %c0_i32_14 = arith.constant 0 : i32
      %34 = arith.cmpi eq, %c8_i32_13, %c0_i32_14 : i32
      %c1_i32_15 = arith.constant 1 : i32
      %35 = arith.select %34, %c1_i32_15, %c8_i32_13 : i32
      %36 = vector.broadcast %35 : i32 to vector<128x128xi32>
      %37 = arith.remsi %33, %36 : vector<128x128xi32>
      %c0_i32_16 = arith.constant 0 : i32
      %38 = vector.broadcast %c0_i32_16 : i32 to vector<128x128xi32>
      %39 = arith.cmpi ne, %37, %38 : vector<128x128xi32>
      %c0_i32_17 = arith.constant 0 : i32
      %40 = vector.broadcast %c0_i32_17 : i32 to vector<128x128xi32>
      %41 = arith.cmpi slt, %37, %40 : vector<128x128xi32>
      %c0_i32_18 = arith.constant 0 : i32
      %42 = arith.cmpi slt, %35, %c0_i32_18 : i32
      %43 = vector.broadcast %42 : i1 to vector<128x128xi1>
      %44 = vector.broadcast %43 : vector<128x128xi1> to vector<128x128xi1>
      %45 = arith.xori %41, %44 : vector<128x128xi1>
      %46 = arith.andi %45, %39 : vector<128x128xi1>
      %47 = vector.broadcast %35 : i32 to vector<128x128xi32>
      %48 = arith.addi %37, %47 : vector<128x128xi32>
      %49 = arith.select %46, %48, %37 : vector<128x128xi1>, vector<128x128xi32>
      %50 = arith.cmpi eq, %32, %49 : vector<128x128xi32>
      %51 = arith.extui %50 : vector<128x128xi1> to vector<128x128xi32>
      %52 = arith.sitofp %51 : vector<128x128xi32> to vector<128x128xf32>
      %c0 = arith.constant 0 : index
      %c0_19 = arith.constant 0 : index
      %53 = vector.load %arg8[%c0, %c0_19] : memref<2x128xf32, #tpu.memory_space<vmem>>, vector<2x128xf32>
      %cst = arith.constant dense<0.000000e+00> : vector<2x128xf32>
      %54 = tpu.matmul %53, %52, %cst {dimension_numbers = #tpu.dot_dimension_numbers<[1], [0], [0], [1], [0, 0, 1, 1], [], []>} : vector<2x128xf32>, vector<128x128xf32>, vector<2x128xf32> -> vector<2x128xf32>
      %55 = vector.extract_strided_slice %54 {offsets = [0, 0], sizes = [1, 128], strides = [1, 1]} : vector<2x128xf32> to vector<1x128xf32>
      %cst_20 = arith.constant 2.44140625E-4 : f32
      %56 = vector.broadcast %cst_20 : f32 to vector<1x128xf32>
      %57 = arith.mulf %55, %56 : vector<1x128xf32>
      %58 = vector.extract_strided_slice %54 {offsets = [1, 0], sizes = [1, 128], strides = [1, 1]} : vector<2x128xf32> to vector<1x128xf32>
      %cst_21 = arith.constant 2.44140625E-4 : f32
      %59 = vector.broadcast %cst_21 : f32 to vector<1x128xf32>
      %60 = arith.mulf %58, %59 : vector<1x128xf32>
      %61 = arith.mulf %57, %57 : vector<1x128xf32>
      %62 = arith.subf %60, %61 : vector<1x128xf32>
      %cst_22 = arith.constant 0.000000e+00 : f32
      %63 = vector.broadcast %cst_22 : f32 to vector<1x128xf32>
      %64 = arith.maximumf %62, %63 : vector<1x128xf32>
      %c0_23 = arith.constant 0 : index
      %c0_24 = arith.constant 0 : index
      %65 = vector.load %arg4[%c0_23, %c0_24] : memref<1x128xf32, #tpu.memory_space<vmem>>, vector<1x128xf32>
      %cst_25 = arith.constant 9.99999974E-6 : f32
      %66 = vector.broadcast %cst_25 : f32 to vector<1x128xf32>
      %67 = arith.addf %64, %66 : vector<1x128xf32>
      %68 = math.rsqrt %67 : vector<1x128xf32>
      %69 = arith.mulf %65, %68 : vector<1x128xf32>
      %c0_26 = arith.constant 0 : index
      %c0_27 = arith.constant 0 : index
      %70 = vector.load %arg5[%c0_26, %c0_27] : memref<1x128xf32, #tpu.memory_space<vmem>>, vector<1x128xf32>
      %71 = arith.mulf %57, %69 : vector<1x128xf32>
      %72 = arith.subf %70, %71 : vector<1x128xf32>
      %c0_28 = arith.constant 0 : index
      %c0_29 = arith.constant 0 : index
      %73 = vector.load %arg9[%c0_28, %c0_29] : memref<2x128xf32, #tpu.memory_space<vmem>>, vector<1x128xf32>
      tpu.vector_store %arg9[%c0_28, %c0_29], %69 {strides = array<i32>} : memref<2x128xf32, #tpu.memory_space<vmem>>, vector<1x128xf32>,
      %c1 = arith.constant 1 : index
      %c0_30 = arith.constant 0 : index
      %74 = vector.load %arg9[%c1, %c0_30] : memref<2x128xf32, #tpu.memory_space<vmem>>, vector<1x128xf32>
      tpu.vector_store %arg9[%c1, %c0_30], %72 {strides = array<i32>} : memref<2x128xf32, #tpu.memory_space<vmem>>, vector<1x128xf32>,
    } else {
    }
    %c1_i32_6 = arith.constant 1 : i32
    %13 = arith.cmpi eq, %arg0, %c1_i32_6 : i32
    %14 = arith.extui %13 : i1 to i32
    %c0_i32_7 = arith.constant 0 : i32
    %15 = arith.cmpi ne, %14, %c0_i32_7 : i32
    scf.if %15 {
      %16 = arith.index_cast %arg1 : i32 to index
      %c0 = arith.constant 0 : index
      %c0_8 = arith.constant 0 : index
      %17 = vector.load %arg7[%16, %c0, %c0_8] : memref<2x144x128xf32, #tpu.memory_space<vmem>>, vector<1x144x128xf32>
      %18 = vector.shape_cast %17 : vector<1x144x128xf32> to vector<144x128xf32>
      %c0_9 = arith.constant 0 : index
      %c0_10 = arith.constant 0 : index
      %19 = vector.load %arg9[%c0_9, %c0_10] : memref<2x128xf32, #tpu.memory_space<vmem>>, vector<1x128xf32>
      %20 = vector.broadcast %19 : vector<1x128xf32> to vector<144x128xf32>
      %21 = arith.mulf %18, %20 : vector<144x128xf32>
      %c1 = arith.constant 1 : index
      %c0_11 = arith.constant 0 : index
      %22 = vector.load %arg9[%c1, %c0_11] : memref<2x128xf32, #tpu.memory_space<vmem>>, vector<1x128xf32>
      %23 = vector.broadcast %22 : vector<1x128xf32> to vector<144x128xf32>
      %24 = arith.addf %21, %23 : vector<144x128xf32>
      %c0_12 = arith.constant 0 : index
      %c0_13 = arith.constant 0 : index
      %25 = vector.load %arg2[%c0_12, %c0_13] : memref<144x128xf32, #tpu.memory_space<vmem>>, vector<144x128xf32>
      %26 = arith.addf %24, %25 : vector<144x128xf32>
      %cst = arith.constant 0.000000e+00 : f32
      %27 = vector.broadcast %cst : f32 to vector<144x128xf32>
      %28 = arith.maximumf %26, %27 : vector<144x128xf32>
      %c0_14 = arith.constant 0 : index
      %c0_15 = arith.constant 0 : index
      %29 = vector.load %arg6[%c0_14, %c0_15] : memref<144x128xf32, #tpu.memory_space<vmem>>, vector<144x128xf32>
      tpu.vector_store %arg6[%c0_14, %c0_15], %28 {strides = array<i32>} : memref<144x128xf32, #tpu.memory_space<vmem>>, vector<144x128xf32>,
    } else {
    }
    return
  }
  func.func @transform_0(%arg0: i32, %arg1: i32) -> (i32, i32) {
    %c0_i32 = arith.constant 0 : i32
    %c0_i32_0 = arith.constant 0 : i32
    return %arg1, %c0_i32 : i32, i32
  }
  func.func @transform_1(%arg0: i32, %arg1: i32) -> (i32, i32, i32) {
    %c0_i32 = arith.constant 0 : i32
    %c0_i32_0 = arith.constant 0 : i32
    %c0_i32_1 = arith.constant 0 : i32
    %c0_i32_2 = arith.constant 0 : i32
    return %c0_i32, %c0_i32_0, %c0_i32_1 : i32, i32, i32
  }
  func.func @transform_2(%arg0: i32, %arg1: i32) -> (i32, i32) {
    %c0_i32 = arith.constant 0 : i32
    %c0_i32_0 = arith.constant 0 : i32
    %c0_i32_1 = arith.constant 0 : i32
    return %c0_i32, %c0_i32_0 : i32, i32
  }
  func.func @transform_3(%arg0: i32, %arg1: i32) -> (i32, i32) {
    %c0_i32 = arith.constant 0 : i32
    %c0_i32_0 = arith.constant 0 : i32
    %c0_i32_1 = arith.constant 0 : i32
    return %c0_i32, %c0_i32_0 : i32, i32
  }
  func.func @transform_4(%arg0: i32, %arg1: i32) -> (i32, i32) {
    %c0_i32 = arith.constant 0 : i32
    %c0_i32_0 = arith.constant 0 : i32
    return %arg1, %c0_i32 : i32, i32
  }
}

</mosaic_0001>

<bundles_post_ra>
// kernel: tile.13
= control target key start
LH: loop header
LB: loop body
LE: loop exit
PB: predicated region body
PF: predicated region fallthrough
CT: control target
= control target key end

     0   :  { %s28_s0 = inlined_call_operand.vmem [shape: f32[8], index: 0, kind: input, shape index: {}]   ;;  %s29_s1 = inlined_call_operand.vmem [shape: f32[16,8], index: 1, kind: output, shape index: {}]  }
   0x1   :  { %v4_v0 = vld [vmem:[%s28_s0] ss:$0 sm:$0xff] }
   0x2   :  { %5 = vst [vmem:[%s29_s1] sm:$0xff] %v4_v0  ;;  %8 = vst [vmem:[%s29_s1 + $0x8] sm:$0xff] %v4_v0 }

// kernel: tile.14
= control target key start
LH: loop header
LB: loop body
LE: loop exit
PB: predicated region body
PF: predicated region fallthrough
CT: control target
= control target key end

     0   :  { %s133_s10 = smov 120   ;;  %s134_s11 = smov 104   ;;  %vm3_vm0 = vcmask 64512   ;;  %vm9_vm1 = vcmask 1048512   ;;  %vm15_vm2 = vcmask 982912   ;;  %vm21_vm3 = vcmask 917312   ;;  %s209_s0 = inlined_call_operand.vmem [shape: f32[16,8], index: 0, kind: input, shape index: {}]   ;;  %s210_s1 = inlined_call_operand.vmem [shape: f32[1,128], index: 1, kind: output, shape index: {}]  }
   0x1   :  { %v103_v0 = vld [vmem:[%s209_s0 + $0xf] sm:$0x1]   ;;  %v105_v1 = vld [vmem:[%s209_s0 + $0xd] sm:$0x1]   ;;  %v104_v2 = vld [vmem:[%s209_s0 + $0xe] sm:$0x1]  }
   0x2   :  { %7 = vrot.lane.b32.xlu0 %v103_v0, %s133_s10  ;;  %19 = vrot.lane.b32.xlu1 %v105_v1, %s134_s11  ;;  %v106_v3 = vld [vmem:[%s209_s0 + $0xc] sm:$0x1]   ;;  %s135_s16 = smov 112   ;;  %s136_s17 = smov 96   ;;  %v107_v4 = vld [vmem:[%s209_s0 + $0xb] sm:$0x1]  }
   0x3   :  { %v108_v5 = vld [vmem:[%s209_s0 + $0xa] sm:$0x1]   ;;  %v2_v6 = vld [vmem:[%s209_s0] sm:$0x1]   ;;  %s137_s24 = smov 88   ;;  %s138_s25 = smov 80  }
   0x4   :  { %4 = vst.msk [vmem:[#allocation0] sm:$0x1] %vm3_vm0, %v2_v6   ;;  %v109_v7 = vld [vmem:[%s209_s0 + $0x9] sm:$0x1]   ;;  %v110_v8 = vld [vmem:[%s209_s0 + $0x8] sm:$0x1]  }
   0x5   :  { %s139_s30 = smov 72   ;;  %s140_s2 = smov 64   ;;  %v111_v9 = vld [vmem:[%s209_s0 + $0x7] sm:$0x1]   ;;  %v112_v10 = vld [vmem:[%s209_s0 + $0x6] sm:$0x1]  }
   0x6   :  { %13 = vrot.lane.b32.xlu0 %v104_v2, %s135_s16  ;;  %25 = vrot.lane.b32.xlu1 %v106_v3, %s136_s17  ;;  %s141_s7 = smov 56   ;;  %s142_s8 = smov 48   ;;  %v113_v11 = vld [vmem:[%s209_s0 + $0x5] sm:$0x1]   ;;  %v114_v12 = vld [vmem:[%s209_s0 + $0x4] sm:$0x1]  }
   0x7   :  { %s143_s13 = smov 40   ;;  %s144_s14 = smov 32   ;;  %v115_v13 = vld [vmem:[%s209_s0 + $0x3] sm:$0x1]   ;;  %v116_v14 = vld [vmem:[%s209_s0 + $0x2] sm:$0x1]  }
   0x8   :  { %s145_s19 = smov 24   ;;  %s146_s20 = smov 16   ;;  %v117_v15 = vld [vmem:[%s209_s0 + $0x1] sm:$0x1]   ;;  %vm27_vm4 = vcmask 851712   ;;  %vm33_vm5 = vcmask 786112  }
   0x9   :  { %s147_s0 = smov 8   ;;  %vm39_vm6 = vcmask 720512   ;;  %vm45_vm7 = vcmask 654912   ;;  %vm51_vm8 = vcmask 589312   ;;  %vm57_vm9 = vcmask 523712  }
   0xa   :  { %31 = vrot.lane.b32.xlu0 %v107_v4, %s137_s24  ;;  %37 = vrot.lane.b32.xlu1 %v108_v5, %s138_s25  ;;  %vm63_vm10 = vcmask 458112   ;;  %vm69_vm11 = vcmask 392512   ;;  %vm75_vm12 = vcmask 326912   ;;  %vm81_vm13 = vcmask 261312  }
   0xb   :  { %vm87_vm14 = vcmask 195712   ;;  %vm93_vm15 = vcmask 130112  }
   0xe   :  { %43 = vrot.lane.b32.xlu0 %v109_v7, %s139_s30  ;;  %49 = vrot.lane.b32.xlu1 %v110_v8, %s140_s2 }
  0x12   :  { %55 = vrot.lane.b32.xlu0 %v111_v9, %s141_s7  ;;  %61 = vrot.lane.b32.xlu1 %v112_v10, %s142_s8 }
  0x16   :  { %67 = vrot.lane.b32.xlu0 %v113_v11, %s143_s13  ;;  %73 = vrot.lane.b32.xlu1 %v114_v12, %s144_s14 }
  0x1a   :  { %79 = vrot.lane.b32.xlu0 %v115_v13, %s145_s19  ;;  %85 = vrot.lane.b32.xlu1 %v116_v14, %s146_s20 }
  0x1e   :  { %91 = vrot.lane.b32.xlu0 %v117_v15, %s147_s0 }
  0x74   :  { %v8_v16 = vpop.permute.xlu0 %7   ;;  %v20_v17 = vpop.permute.xlu1 %19  }
  0x75   :  { %10 = vst.msk [vmem:[#allocation0] sm:$0x1] %vm9_vm1, %v8_v16  }
  0x78   :  { %v14_v18 = vpop.permute.xlu0 %13   ;;  %v26_v19 = vpop.permute.xlu1 %25  }
  0x79   :  { %16 = vst.msk [vmem:[#allocation0] sm:$0x1] %vm15_vm2, %v14_v18  }
  0x7a   :  { %22 = vst.msk [vmem:[#allocation0] sm:$0x1] %vm21_vm3, %v20_v17  }
  0x7b   :  { %28 = vst.msk [vmem:[#allocation0] sm:$0x1] %vm27_vm4, %v26_v19  }
  0x7c   :  { %v32_v20 = vpop.permute.xlu0 %31   ;;  %v38_v21 = vpop.permute.xlu1 %37  }
  0x7d   :  { %34 = vst.msk [vmem:[#allocation0] sm:$0x1] %vm33_vm5, %v32_v20  }
  0x7e   :  { %40 = vst.msk [vmem:[#allocation0] sm:$0x1] %vm39_vm6, %v38_v21  }
  0x80   :  { %v44_v22 = vpop.permute.xlu0 %43   ;;  %v50_v23 = vpop.permute.xlu1 %49  }
  0x81   :  { %46 = vst.msk [vmem:[#allocation0] sm:$0x1] %vm45_vm7, %v44_v22  }
  0x82   :  { %52 = vst.msk [vmem:[#allocation0] sm:$0x1] %vm51_vm8, %v50_v23  }
  0x84   :  { %v56_v24 = vpop.permute.xlu0 %55   ;;  %v62_v25 = vpop.permute.xlu1 %61  }
  0x85   :  { %58 = vst.msk [vmem:[#allocation0] sm:$0x1] %vm57_vm9, %v56_v24  }
  0x86   :  { %64 = vst.msk [vmem:[#allocation0] sm:$0x1] %vm63_vm10, %v62_v25  }
  0x88   :  { %v68_v26 = vpop.permute.xlu0 %67   ;;  %v74_v27 = vpop.permute.xlu1 %73  }
  0x89   :  { %70 = vst.msk [vmem:[#allocation0] sm:$0x1] %vm69_vm11, %v68_v26  }
  0x8a   :  { %76 = vst.msk [vmem:[#allocation0] sm:$0x1] %vm75_vm12, %v74_v27  }
  0x8c   :  { %v80_v28 = vpop.permute.xlu0 %79   ;;  %v86_v29 = vpop.permute.xlu1 %85  }
  0x8d   :  { %82 = vst.msk [vmem:[#allocation0] sm:$0x1] %vm81_vm13, %v80_v28  }
  0x8e   :  { %88 = vst.msk [vmem:[#allocation0] sm:$0x1] %vm87_vm14, %v86_v29  }
  0x90   :  { %v92_v30 = vpop.permute.xlu0 %91  }
  0x91   :  { %94 = vst.msk [vmem:[#allocation0] sm:$0x1] %vm93_vm15, %v92_v30  }
  0x98   :  { %v99_v31 = vld [vmem:[#allocation0] sm:$0x1] }
  0x99   :  { %102 = vst [vmem:[%s210_s1] sm:$0x1] %v99_v31 }

// kernel: basic_block_forward.1
= control target key start
LH: loop header
LB: loop body
LE: loop exit
PB: predicated region body
PF: predicated region fallthrough
CT: control target
= control target key end

     0   :  { %s2609_s15 = smov 0   ;;  %s2611_s16 = smov 0   ;;  %s3893_s0 = inlined_call_operand.vmem [shape: f32[288,128], index: 0, kind: input, shape index: {}]   ;;  %s3894_s1 = inlined_call_operand.vmem [shape: f32[3,128,128], index: 1, kind: input, shape index: {}]   ;;  %s3895_s2 = inlined_call_operand.vmem [shape: f32[1,128], index: 2, kind: input, shape index: {}]   ;;  %s3896_s3 = inlined_call_operand.vmem [shape: f32[1,128], index: 3, kind: input, shape index: {}]   ;;  %s3897_s4 = inlined_call_operand.vmem [shape: f32[288,128], index: 4, kind: output, shape index: {}]  }
   0x1   :  { %s2613_s17 = smov 0   ;;  %s2615_s18 = smov 0  }
   0x2   :  { %s2617_s19 = smov 0  }
   0x3 LB: > { %s23_s20 = sadd.s32 1, %s2569_s17  ;;  %s26_s21 = sadd.s32 1, %s2573_s18  ;;  %s2577_s19 = sphi %s2617_s19, %s14_s19   ;;  %s2573_s18 = sphi %s2615_s18, %s3973_s18   ;;  %s2569_s17 = sphi %s2613_s17, %s3972_s17   ;;  %s2565_s16 = sphi %s2611_s16, %s3971_s16   ;;  %s2561_s15 = sphi %s2609_s15, %s3970_s15  }
   0x4   : > { %p24_p0 = scmp.ge.s32.totalorder %s23_s20, 2  ;;  %p2020_p1 = scmp.ge.s32.totalorder %s2577_s19, 1 }
   0x5   : > { %p175_p2 = scmp.lt.s32.totalorder %s2577_s19, 5 }
   0x6   : > { %s3975_s20 = smov (%p24_p0, %s23_s20), 0  ;;  %s3977_s21 = smov (!%p24_p0, %s26_s21), %s2573_s18 }
   0x7   : > { %p176_p3 = pnand %p2020_p1, %p175_p2  ;;  %p28_p4 = scmp.ge.s32.totalorder %s3977_s21, 2 }
   0x8   : > { %s201_s22 = smul.u32 (!%p176_p3), 18, %s2561_s15  ;;  %p213_p5 = scmp.eq.s32.totalorder (!%p176_p3), %s2565_s16, 0 }
   0x9   : > { %s3979_s21 = smov (%p28_p4, %s3977_s21), 0  ;;  %179 = sbr.rel (%p176_p3) target bundleno = 692 (0x2b4), region = 36 }
   0xa   : > { %p214_p6 = scmp.eq.s32.totalorder (!%p176_p3), %s2561_s15, 0  ;;  %p202_p7 = scmp.lt.s32.totalorder (!%p176_p3), %s201_s22, 35 }
   0xc   : > { %p215_p8 = pnand (!%p176_p3), %p214_p6, %p213_p5 }
   0xe   : > { %s3981_s22 = smov (!%p202_p7, %s201_s22), 35  ;;  %218 = sbr.rel (%p215_p8) target bundleno = 21 (0x15), region = 40 }
   0xf   : > { %s2021_s23 = sshll.u32 %s3981_s22, 3 }
  0x10   : > { %s2651_s26 = scalar_lea.vmem %s3893_s0, %s2021_s23  ;;  %s2656_s29 = scalar_lea.vmem %s3897_s4, %s2021_s23 }
  0x13   : > { %v2579_v0 = vmov 0.0  }
  0x14   : > { %219 = vst [vmem:[#allocation3] sm:$0x3] %v2579_v0 }
  0x15 PF: > { %p2023_p9 = scmp.ne.s32.totalorder %s2565_s16, 0 }
  0x17   : > { %222 = sbr.rel (%p2023_p9) target bundleno = 377 (0x179), region = 44 }
  0x1c   : > { %v256_v1 = vld [vmem:[%s3894_s1 + $0x78] sm:$0xff]  ;;  %v255_v3 = vld [vmem:[%s3894_s1 + $0x70] sm:$0xff]  ;;  %v254_v5 = vld [vmem:[%s3894_s1 + $0x68] sm:$0xff]  ;;  %s938_s22 = smul.u32 144, %s2561_s15 }
  0x1d   : > { %v2039_v2 = vld [vmem:[%s3894_s1 + $0xf8] sm:$0xff]  ;;  %2212 = vmatprep.subr.mxu0 %v256_v1  ;;  %v2038_v4 = vld [vmem:[%s3894_s1 + $0xf0] sm:$0xff]  ;;  %v2037_v6 = vld [vmem:[%s3894_s1 + $0xe8] sm:$0xff] }
  0x1e   : > { %2271 = vmatprep.subr.mxu1 %v2039_v2  ;;  %2213 = vmatpush3.msra.mxu0 %v256_v1  ;;  %v253_v7 = vld [vmem:[%s3894_s1 + $0x60] sm:$0xff]  ;;  %v252_v9 = vld [vmem:[%s3894_s1 + $0x58] sm:$0xff]  ;;  %v251_v11 = vld [vmem:[%s3894_s1 + $0x50] sm:$0xff]  ;;  %s3367_s23 = scalar_lea.vmem [#allocation2], %s938_s22 }
  0x1f   : > { %2272 = vmatpush3.msra.mxu1 %v2039_v2  ;;  %2214 = vmatprep.subr.mxu0 %v255_v3  ;;  %v2036_v8 = vld [vmem:[%s3894_s1 + $0xe0] sm:$0xff]  ;;  %v2035_v10 = vld [vmem:[%s3894_s1 + $0xd8] sm:$0xff]  ;;  %v2034_v12 = vld [vmem:[%s3894_s1 + $0xd0] sm:$0xff] }
  0x20   : > { %2273 = vmatprep.subr.mxu1 %v2038_v4  ;;  %2215 = vmatpush3.msra.mxu0 %v255_v3  ;;  %v250_v13 = vld [vmem:[%s3894_s1 + $0x48] sm:$0xff]  ;;  %v249_v15 = vld [vmem:[%s3894_s1 + $0x40] sm:$0xff]  ;;  %v248_v17 = vld [vmem:[%s3894_s1 + $0x38] sm:$0xff]  ;;  %v976_v3 = vlaneseq }
  0x21   : > { %2274 = vmatpush3.msra.mxu1 %v2038_v4  ;;  %2216 = vmatprep.subr.mxu0 %v254_v5  ;;  %v2033_v14 = vld [vmem:[%s3894_s1 + $0xc8] sm:$0xff]  ;;  %v2032_v16 = vld [vmem:[%s3894_s1 + $0xc0] sm:$0xff]  ;;  %v2031_v18 = vld [vmem:[%s3894_s1 + $0xb8] sm:$0xff] }
  0x22   : > { %2275 = vmatprep.subr.mxu1 %v2037_v6  ;;  %2217 = vmatpush3.msra.mxu0 %v254_v5  ;;  %v247_v19 = vld [vmem:[%s3894_s1 + $0x30] sm:$0xff]  ;;  %v246_v21 = vld [vmem:[%s3894_s1 + $0x28] sm:$0xff]  ;;  %v245_v23 = vld [vmem:[%s3894_s1 + $0x20] sm:$0xff]  ;;  %v2881_v4 = vshrl.u32 %v976_v3, 7 }
  0x23   : > { %2276 = vmatpush3.msra.mxu1 %v2037_v6  ;;  %2218 = vmatprep.subr.mxu0 %v253_v7  ;;  %v2030_v20 = vld [vmem:[%s3894_s1 + $0xb0] sm:$0xff]  ;;  %v2029_v22 = vld [vmem:[%s3894_s1 + $0xa8] sm:$0xff]  ;;  %v2028_v24 = vld [vmem:[%s3894_s1 + $0xa0] sm:$0xff] }
  0x24   : > { %2277 = vmatprep.subr.mxu1 %v2036_v8  ;;  %2219 = vmatpush3.msra.mxu0 %v253_v7  ;;  %v244_v25 = vld [vmem:[%s3894_s1 + $0x18] sm:$0xff]  ;;  %v243_v27 = vld [vmem:[%s3894_s1 + $0x10] sm:$0xff]  ;;  %v242_v29 = vld [vmem:[%s3894_s1 + $0x8] sm:$0xff]  ;;  %v987_v5 = vadd.s32 80, %v2881_v4  ;;  %v2885_v6 = vmul.u32.u64.low 3817748708, %v2881_v4  ;;  %v2886_v7 = vmul.u32.u64.high 3817748708, %v2881_v4, %v2885_v6 }
  0x25   : > { %2278 = vmatpush3.msra.mxu1 %v2036_v8  ;;  %2220 = vmatprep.subr.mxu0 %v252_v9  ;;  %v2027_v26 = vld [vmem:[%s3894_s1 + $0x98] sm:$0xff]  ;;  %v2026_v28 = vld [vmem:[%s3894_s1 + $0x90] sm:$0xff]  ;;  %v2025_v30 = vld [vmem:[%s3894_s1 + $0x88] sm:$0xff]  ;;  %v2993_v6 = vadd.s32 64, %v2881_v4 }
  0x26   : > { %2279 = vmatprep.subr.mxu1 %v2035_v10  ;;  %2221 = vmatpush3.msra.mxu0 %v252_v9  ;;  %v241_v31 = vld [vmem:[%s3894_s1] sm:$0xff]  ;;  %v2759_v34 = vld [vmem:[%s2651_s26 + $0x8] sm:$0xff]  ;;  %v2055_v35 = vld [vmem:[%s3894_s1 + $0x178] sm:$0xff]  ;;  %v2888_v8 = vmul.u32.u64.low 3817748708, %v987_v5  ;;  %v2889_v9 = vmul.u32.u64.high 3817748708, %v987_v5, %v2888_v8 }
  0x27   : > { %2280 = vmatpush3.msra.mxu1 %v2035_v10  ;;  %2222 = vmatprep.subr.mxu0 %v251_v11  ;;  %v2024_v32 = vld [vmem:[%s3894_s1 + $0x80] sm:$0xff]  ;;  %v2766_v36 = vld [vmem:[%s2651_s26 + $0x10] sm:$0xff]  ;;  %v2776_v38 = vld [vmem:[%s2651_s26 + $0x18] sm:$0xff]  ;;  %v978_v10 = vadd.s32 8, %v2881_v4 }
  0x28   : > { %2281 = vmatprep.subr.mxu1 %v2034_v12  ;;  %2223 = vmatpush3.msra.mxu0 %v251_v11  ;;  %v2756_v33 = vld [vmem:[%s2651_s26] sm:$0xff]  ;;  %v2054_v37 = vld [vmem:[%s3894_s1 + $0x170] sm:$0xff]  ;;  %v2053_v39 = vld [vmem:[%s3894_s1 + $0x168] sm:$0xff]  ;;  %v979_v11 = vadd.s32 16, %v2881_v4 }
  0x29   : > { %2282 = vmatpush3.msra.mxu1 %v2034_v12  ;;  %2224 = vmatprep.subr.mxu0 %v250_v13  ;;  %v2785_v40 = vld [vmem:[%s2651_s26 + $0x20] sm:$0xff]  ;;  %v2791_v42 = vld [vmem:[%s2651_s26 + $0x28] sm:$0xff]  ;;  %v2051_v43 = vld [vmem:[%s3894_s1 + $0x158] sm:$0xff] }
  0x2a   : > { %2283 = vmatprep.subr.mxu1 %v2033_v14  ;;  %2225 = vmatpush3.msra.mxu0 %v250_v13  ;;  %v2052_v41 = vld [vmem:[%s3894_s1 + $0x160] sm:$0xff]  ;;  %v2801_v44 = vld [vmem:[%s2651_s26 + $0x30] sm:$0xff]  ;;  %v2804_v45 = vld [vmem:[%s2651_s26 + $0x38] sm:$0xff] }
  0x2b   : > { %2284 = vmatpush3.msra.mxu1 %v2033_v14  ;;  %2226 = vmatprep.subr.mxu0 %v249_v15  ;;  %v2050_v46 = vld [vmem:[%s3894_s1 + $0x150] sm:$0xff]  ;;  %v2049_v47 = vld [vmem:[%s3894_s1 + $0x148] sm:$0xff]  ;;  %v2817_v48 = vld [vmem:[%s2651_s26 + $0x40] sm:$0xff] }
  0x2c   : > { %2285 = vmatprep.subr.mxu1 %v2032_v16  ;;  %2227 = vmatpush3.msra.mxu0 %v249_v15  ;;  %v2820_v49 = vld [vmem:[%s2651_s26 + $0x48] sm:$0xff]  ;;  %v2048_v50 = vld [vmem:[%s3894_s1 + $0x140] sm:$0xff]  ;;  %v2047_v51 = vld [vmem:[%s3894_s1 + $0x138] sm:$0xff]  ;;  %v2897_v14 = vmul.u32.u64.low 3817748708, %v978_v10  ;;  %v2898_v15 = vmul.u32.u64.high 3817748708, %v978_v10, %v2897_v14 }
  0x2d   : > { %2286 = vmatpush3.msra.mxu1 %v2032_v16  ;;  %2228 = vmatprep.subr.mxu0 %v248_v17  ;;  %v2833_v52 = vld [vmem:[%s2651_s26 + $0x50] sm:$0xff]  ;;  %v2836_v53 = vld [vmem:[%s2651_s26 + $0x58] sm:$0xff]  ;;  %v235_v55 = vld [vmem:[%s2651_s26 + $0x60] sm:$0xff]  ;;  %v2901_v16 = vadd.s32 88, %v2881_v4 }
  0x2e   : > { %2287 = vmatprep.subr.mxu1 %v2031_v18  ;;  %2229 = vmatpush3.msra.mxu0 %v248_v17  ;;  %v2046_v54 = vld [vmem:[%s3894_s1 + $0x130] sm:$0xff]  ;;  %v2045_v56 = vld [vmem:[%s3894_s1 + $0x128] sm:$0xff]  ;;  %v2044_v58 = vld [vmem:[%s3894_s1 + $0x120] sm:$0xff] }
  0x2f   : > { %2288 = vmatpush3.msra.mxu1 %v2031_v18  ;;  %2230 = vmatprep.subr.mxu0 %v247_v19  ;;  %v236_v57 = vld [vmem:[%s2651_s26 + $0x68] sm:$0xff]  ;;  %v237_v59 = vld [vmem:[%s2651_s26 + $0x70] sm:$0xff]  ;;  %v2043_v60 = vld [vmem:[%s3894_s1 + $0x118] sm:$0xff] }
  0x30   : > { %2289 = vmatprep.subr.mxu1 %v2030_v20  ;;  %2231 = vmatpush3.msra.mxu0 %v247_v19  ;;  %v238_v61 = vld [vmem:[%s2651_s26 + $0x78] sm:$0xff]  ;;  %v2042_v62 = vld [vmem:[%s3894_s1 + $0x110] sm:$0xff]  ;;  %v239_v63 = vld [vmem:[%s2651_s26 + $0x80] sm:$0xff]  ;;  %v1001_v19 = vshrl.u32 %v2886_v7, 4 }
  0x31   : > { %2290 = vmatpush3.msra.mxu1 %v2030_v20  ;;  %2232 = vmatprep.subr.mxu0 %v246_v21  ;;  %v240_v0 = vld [vmem:[%s2651_s26 + $0x88] sm:$0xff]  ;;  %v2040_v2 = vld [vmem:[%s3894_s1 + $0x100] sm:$0xff] }
  0x32   : > { %2291 = vmatprep.subr.mxu1 %v2029_v22  ;;  %2233 = vmatpush3.msra.mxu0 %v246_v21  ;;  %v2041_v1 = vld [vmem:[%s3894_s1 + $0x108] sm:$0xff]  ;;  %v2908_v20 = vmul.u32.u64.low 3817748708, %v979_v11  ;;  %v2909_v21 = vmul.u32.u64.high 3817748708, %v979_v11, %v2908_v20 }
  0x33   : > { %2292 = vmatpush3.msra.mxu1 %v2029_v22  ;;  %2234 = vmatprep.subr.mxu0 %v245_v23  ;;  %v1111_v22 = vshrl.u32 %v2889_v9, 4 }
  0x34   : > { %2293 = vmatprep.subr.mxu1 %v2028_v24  ;;  %2235 = vmatpush3.msra.mxu0 %v245_v23 }
  0x35   : > { %2294 = vmatpush3.msra.mxu1 %v2028_v24  ;;  %2236 = vmatprep.subr.mxu0 %v244_v25 }
  0x36   : > { %2295 = vmatprep.subr.mxu1 %v2027_v26  ;;  %2237 = vmatpush3.msra.mxu0 %v244_v25 }
  0x37   : > { %2296 = vmatpush3.msra.mxu1 %v2027_v26  ;;  %2238 = vmatprep.subr.mxu0 %v243_v27  ;;  %v2917_v25 = vmul.u32.u64.low 3817748708, %v2901_v16  ;;  %v2918_v26 = vmul.u32.u64.high 3817748708, %v2901_v16, %v2917_v25 }
  0x38   : > { %2297 = vmatprep.subr.mxu1 %v2026_v28  ;;  %2239 = vmatpush3.msra.mxu0 %v243_v27  ;;  %v2921_v27 = vadd.s32 96, %v2881_v4 }
  0x39   : > { %2298 = vmatpush3.msra.mxu1 %v2026_v28  ;;  %2240 = vmatprep.subr.mxu0 %v242_v29 }
  0x3a   : > { %2299 = vmatprep.subr.mxu1 %v2025_v30  ;;  %2241 = vmatpush3.msra.mxu0 %v242_v29 }
  0x3b   : > { %2300 = vmatpush3.msra.mxu1 %v2025_v30  ;;  %2242 = vmatprep.subr.mxu0 %v241_v31  ;;  %v1002_v30 = vmul.u32 18, %v1001_v19 }
  0x3c   : > { %2301 = vmatprep.subr.mxu1 %v2024_v32  ;;  %2243 = vmatpush3.msra.mxu0 %v241_v31  ;;  %v1112_v31 = vmul.u32 18, %v1111_v22 }
  0x3d   : > { %2244 = vmatprep.mubr.f32.mxu0 %v2756_v33  ;;  %2302 = vmatpush3.msra.mxu1 %v2024_v32  ;;  %v1012_v32 = vshrl.u32 %v2898_v15, 4 }
  0x3e   : > { %2303 = vmatprep.mubr.f32.mxu1 %v2756_v33  ;;  %2245 = vmatmul.mubr.f32.vlgmr.msra.gmra.mxu0 %v2759_v34 }
  0x3f   : > { %2304 = vmatmul.mubr.f32.vlgmr.msra.gmra.mxu1 %v2759_v34  ;;  %2330 = vmatprep.subr.mxu0 %v2055_v35 }
  0x40   : > { %2247 = vmatprep.mubr.f32.mxu0 %v2766_v36  ;;  %2331 = vmatpush3.msra.mxu0 %v2055_v35 }
  0x41   : > { %2306 = vmatprep.mubr.f32.mxu1 %v2766_v36  ;;  %2332 = vmatprep.subr.mxu0 %v2054_v37 }
  0x42   : > { %2424 = vmatprep.subr.mxu1 %v2055_v35  ;;  %2248 = vmatmul.mubr.f32.gmra.mxu0 %v2776_v38 }
  0x43   : > { %2307 = vmatmul.mubr.f32.gmra.mxu1 %v2776_v38  ;;  %2333 = vmatpush3.msra.mxu0 %v2054_v37 }
  0x44   : > { %2440 = vmatpush3.msra.mxu1 %v2055_v35  ;;  %2334 = vmatprep.subr.mxu0 %v2053_v39 }
  0x45   : > { %2425 = vmatprep.subr.mxu1 %v2054_v37  ;;  %2335 = vmatpush3.msra.mxu0 %v2053_v39 }
  0x46   : > { %2250 = vmatprep.mubr.f32.mxu0 %v2785_v40  ;;  %2309 = vmatprep.mubr.f32.mxu1 %v2785_v40 }
  0x47   : > { %2441 = vmatpush3.msra.mxu1 %v2054_v37  ;;  %2336 = vmatprep.subr.mxu0 %v2052_v41  ;;  %v2938_v37 = vadd.s32 32, %v2881_v4 }
  0x48   : > { %2251 = vmatmul.mubr.f32.gmra.mxu0 %v2791_v42  ;;  %2310 = vmatmul.mubr.f32.gmra.mxu1 %v2791_v42 }
  0x49   : > { %2426 = vmatprep.subr.mxu1 %v2053_v39  ;;  %2337 = vmatpush3.msra.mxu0 %v2052_v41 }
  0x4a   : > { %2442 = vmatpush3.msra.mxu1 %v2053_v39  ;;  %2338 = vmatprep.subr.mxu0 %v2051_v43  ;;  %v1003_v39 = vsub.s32 %v2881_v4, %v1002_v30 }
  0x4b   : > { %2427 = vmatprep.subr.mxu1 %v2052_v41  ;;  %2339 = vmatpush3.msra.mxu0 %v2051_v43 }
  0x4c   : > { %2253 = vmatprep.mubr.f32.mxu0 %v2801_v44  ;;  %2312 = vmatprep.mubr.f32.mxu1 %v2801_v44  ;;  %vm1193_vm0 = vcmp.ne.s32.totalorder %v1003_v39, 0  ;;  %vm1211_vm1 = vcmp.lt.s32.totalorder %v1003_v39, 0 }
  0x4d   : > { %2443 = vmatpush3.msra.mxu1 %v2052_v41  ;;  %2254 = vmatmul.mubr.f32.gmra.mxu0 %v2804_v45  ;;  %vm2997_vm4 = vmand %vm1211_vm1, %vm1193_vm0 }
  0x4e   : > { %2313 = vmatmul.mubr.f32.gmra.mxu1 %v2804_v45  ;;  %2428 = vmatprep.subr.mxu1 %v2051_v43 }
  0x4f   : > { %2340 = vmatprep.subr.mxu0 %v2050_v46  ;;  %2444 = vmatpush3.msra.mxu1 %v2051_v43 }
  0x50   : > { %2341 = vmatpush3.msra.mxu0 %v2050_v46  ;;  %2429 = vmatprep.subr.mxu1 %v2050_v46 }
  0x51   : > { %2342 = vmatprep.subr.mxu0 %v2049_v47  ;;  %2256 = vmatprep.mubr.f32.mxu0 %v2817_v48 }
  0x52   : > { %2315 = vmatprep.mubr.f32.mxu1 %v2817_v48  ;;  %2445 = vmatpush3.msra.mxu1 %v2050_v46 }
  0x53   : > { %2343 = vmatpush3.msra.mxu0 %v2049_v47  ;;  %2316 = vmatmul.mubr.f32.gmra.mxu1 %v2820_v49 }
  0x54   : > { %2257 = vmatmul.mubr.f32.gmra.mxu0 %v2820_v49  ;;  %2430 = vmatprep.subr.mxu1 %v2049_v47 }
  0x55   : > { %2344 = vmatprep.subr.mxu0 %v2048_v50  ;;  %2446 = vmatpush3.msra.mxu1 %v2049_v47 }
  0x56   : > { %2345 = vmatpush3.msra.mxu0 %v2048_v50  ;;  %2431 = vmatprep.subr.mxu1 %v2048_v50 }
  0x57   : > { %2346 = vmatprep.subr.mxu0 %v2047_v51  ;;  %2259 = vmatprep.mubr.f32.mxu0 %v2833_v52 }
  0x58   : > { %2318 = vmatprep.mubr.f32.mxu1 %v2833_v52  ;;  %2447 = vmatpush3.msra.mxu1 %v2048_v50 }
  0x59   : > { %2347 = vmatpush3.msra.mxu0 %v2047_v51  ;;  %2319 = vmatmul.mubr.f32.gmra.mxu1 %v2836_v53 }
  0x5a   : > { %2260 = vmatmul.mubr.f32.gmra.mxu0 %v2836_v53  ;;  %2432 = vmatprep.subr.mxu1 %v2047_v51 }
  0x5b   : > { %2348 = vmatprep.subr.mxu0 %v2046_v54  ;;  %2448 = vmatpush3.msra.mxu1 %v2047_v51  ;;  %v2958_v51 = vadd.s32 40, %v2881_v4 }
  0x5c   : > { %2349 = vmatpush3.msra.mxu0 %v2046_v54  ;;  %2433 = vmatprep.subr.mxu1 %v2046_v54 }
  0x5d   : > { %2262 = vmatprep.mubr.f32.mxu0 %v235_v55  ;;  %2321 = vmatprep.mubr.f32.mxu1 %v235_v55 }
  0x5e   : > { %2449 = vmatpush3.msra.mxu1 %v2046_v54  ;;  %2350 = vmatprep.subr.mxu0 %v2045_v56  ;;  %v1247_v54 = vadd.s32 18, %v1003_v39 }
  0x5f   : > { %2263 = vmatmul.mubr.f32.gmra.mxu0 %v236_v57  ;;  %2322 = vmatmul.mubr.f32.gmra.mxu1 %v236_v57 }
  0x60   : > { %2434 = vmatprep.subr.mxu1 %v2045_v56  ;;  %2351 = vmatpush3.msra.mxu0 %v2045_v56 }
  0x61   : > { %2450 = vmatpush3.msra.mxu1 %v2045_v56  ;;  %2352 = vmatprep.subr.mxu0 %v2044_v58  ;;  %v2968_v56 = vadd.s32 48, %v2881_v4 }
  0x62   : > { %2435 = vmatprep.subr.mxu1 %v2044_v58  ;;  %2353 = vmatpush3.msra.mxu0 %v2044_v58 }
  0x63   : > { %2265 = vmatprep.mubr.f32.mxu0 %v237_v59  ;;  %2324 = vmatprep.mubr.f32.mxu1 %v237_v59 }
  0x64   : > { %2451 = vmatpush3.msra.mxu1 %v2044_v58  ;;  %2354 = vmatprep.subr.mxu0 %v2043_v60  ;;  %v2971_v58 = vadd.s32 112, %v2881_v4 }
  0x65   : > { %2266 = vmatmul.mubr.f32.gmra.mxu0 %v238_v61  ;;  %2325 = vmatmul.mubr.f32.gmra.mxu1 %v238_v61 }
  0x66   : > { %2436 = vmatprep.subr.mxu1 %v2043_v60  ;;  %2355 = vmatpush3.msra.mxu0 %v2043_v60  ;;  %v3012_v14 = vmul.u32.u64.low 3817748708, %v2971_v58  ;;  %v3013_v15 = vmul.u32.u64.high 3817748708, %v2971_v58, %v3012_v14 }
  0x67   : > { %2452 = vmatpush3.msra.mxu1 %v2043_v60  ;;  %2356 = vmatprep.subr.mxu0 %v2042_v62 }
  0x68   : > { %2437 = vmatprep.subr.mxu1 %v2042_v62  ;;  %2268 = vmatprep.mubr.f32.mxu0 %v239_v63 }
  0x69   : > { %2327 = vmatprep.mubr.f32.mxu1 %v239_v63  ;;  %2357 = vmatpush3.msra.mxu0 %v2042_v62 }
  0x6a   : > { %2453 = vmatpush3.msra.mxu1 %v2042_v62  ;;  %2269 = vmatmul.mubr.f32.gmra.mxu0 %v240_v0 }
  0x6b   : > { %2328 = vmatmul.mubr.f32.gmra.mxu1 %v240_v0  ;;  %2358 = vmatprep.subr.mxu0 %v2041_v1 }
  0x6c   : > { %2438 = vmatprep.subr.mxu1 %v2041_v1  ;;  %2359 = vmatpush3.msra.mxu0 %v2041_v1 }
  0x6d   : > { %2454 = vmatpush3.msra.mxu1 %v2041_v1  ;;  %2360 = vmatprep.subr.mxu0 %v2040_v2  ;;  %v2984_v1 = vadd.s32 56, %v2881_v4 }
  0x6e   : > { %2439 = vmatprep.subr.mxu1 %v2040_v2  ;;  %2361 = vmatpush3.msra.mxu0 %v2040_v2 }
  0x6f   : > { %2455 = vmatpush3.msra.mxu1 %v2040_v2  ;;  %2362 = vmatprep.mubr.f32.mxu0 %v2756_v33 }
  0x70   : > { %2377 = vmatprep.mubr.f32.mxu1 %v2833_v52  ;;  %2363 = vmatmul.mubr.f32.vlgmr.msra.gmra.mxu0 %v2759_v34  ;;  %v2931_v34 = vmul.u32.u64.low 3817748708, %v2921_v27  ;;  %v2932_v35 = vmul.u32.u64.high 3817748708, %v2921_v27, %v2931_v34 }
  0x71   : > { %2378 = vmatmul.mubr.f32.vlgmr.msra.gmra.mxu1 %v2836_v53  ;;  %2365 = vmatprep.mubr.f32.mxu0 %v2766_v36  ;;  %v2935_v36 = vadd.s32 24, %v2881_v4 }
  0x72   : > { %2380 = vmatprep.mubr.f32.mxu1 %v235_v55  ;;  %v2965_v55 = vadd.s32 104, %v2881_v4 }
  0x73   : > { %v2950_v46 = vmul.u32.u64.low 3817748708, %v2935_v36  ;;  %v2951_v47 = vmul.u32.u64.high 3817748708, %v2935_v36, %v2950_v46 }
  0x74   : > { %2366 = vmatmul.mubr.f32.gmra.mxu0 %v2776_v38  ;;  %v3002_v8 = vmul.u32.u64.low 3817748708, %v2965_v55  ;;  %v3003_v9 = vmul.u32.u64.high 3817748708, %v2965_v55, %v3002_v8  ;;  %v3042_v46 = vsel %vm2997_vm4, %v1247_v54, %v1003_v39 }
  0x75   : > { %2381 = vmatmul.mubr.f32.gmra.mxu1 %v236_v57  ;;  %2368 = vmatprep.mubr.f32.mxu0 %v2785_v40  ;;  %v1023_v40 = vshrl.u32 %v2909_v21, 4  ;;  %v1034_v25 = vshrl.u32 %v2951_v47, 4 }
  0x76   : > { %2383 = vmatprep.mubr.f32.mxu1 %v237_v59  ;;  %v2974_v59 = vadd.s32 72, %v2881_v4  ;;  %v1144_v7 = vshrl.u32 %v3003_v9, 4 }
  0x77   : > { %v1024_v50 = vmul.u32 18, %v1023_v40 }
  0x78   : > { %2369 = vmatmul.mubr.f32.gmra.mxu0 %v2791_v42  ;;  %v1113_v42 = vsub.s32 %v987_v5, %v1112_v31  ;;  %v2989_v3 = vmul.u32.u64.low 3817748708, %v2958_v51  ;;  %v2990_v5 = vmul.u32.u64.high 3817748708, %v2958_v51, %v2989_v3 }
  0x79   : > { %2384 = vmatmul.mubr.f32.gmra.mxu1 %v238_v61  ;;  %2371 = vmatprep.mubr.f32.mxu0 %v2801_v44  ;;  %v1013_v44 = vmul.u32 18, %v1012_v32  ;;  %v2986_v2 = vsub.s32 %v979_v11, %v1024_v50  ;;  %v3016_v19 = vmul.u32.u64.low 3817748708, %v2974_v59  ;;  %v3017_v20 = vmul.u32.u64.high 3817748708, %v2974_v59, %v3016_v19 }
  0x7a   : > { %2386 = vmatprep.mubr.f32.mxu1 %v239_v63  ;;  %vm1203_vm2 = vcmp.ne.s32.totalorder %v1113_v42, 0  ;;  %vm1221_vm3 = vcmp.lt.s32.totalorder %v1113_v42, 0  ;;  %v1257_v57 = vadd.s32 18, %v1113_v42 }
  0x7b   : > { %v2980_v62 = vsub.s32 %v978_v10, %v1013_v44  ;;  %v3006_v10 = vmul.u32.u64.low 3817748708, %v2968_v56  ;;  %v3007_v11 = vmul.u32.u64.high 3817748708, %v2968_v56, %v3006_v10  ;;  %vm1239_vm5 = vmand %vm1221_vm3, %vm1203_vm2  ;;  %vm1195_vm7 = vcmp.ne.s32.totalorder %v2986_v2, 0 }
  0x7c   : > { %2372 = vmatmul.mubr.f32.gmra.mxu0 %v2804_v45  ;;  %v1122_v45 = vshrl.u32 %v2918_v26, 4  ;;  %v3026_v30 = vmul.u32.u64.low 3817748708, %v2984_v1  ;;  %v3027_v31 = vmul.u32.u64.high 3817748708, %v2984_v1, %v3026_v30  ;;  %v3044_v47 = vsel %vm1239_vm5, %v1257_v57, %v1113_v42 }
  0x7d   : > { %2387 = vmatmul.mubr.f32.gmra.mxu1 %v240_v0  ;;  %2374 = vmatprep.mubr.f32.mxu0 %v2817_v48  ;;  %v1133_v0 = vshrl.u32 %v2932_v35, 4  ;;  %v3033_v35 = vmul.u32.u64.low 3817748708, %v2993_v6  ;;  %v3034_v40 = vmul.u32.u64.high 3817748708, %v2993_v6, %v3033_v35  ;;  %3908 = vst [vmem:[#allocation8_spill] sm:$0xff] %v3044_v47  ;;  %vm1194_vm6 = vcmp.ne.s32.totalorder %v2980_v62, 0 }
  0x7e   : > { %v1123_v63 = vmul.u32 18, %v1122_v45  ;;  %vm1212_vm8 = vcmp.lt.s32.totalorder %v2980_v62, 0  ;;  %vm1213_vm9 = vcmp.lt.s32.totalorder %v2986_v2, 0  ;;  %v1249_v39 = vadd.s32 18, %v2986_v2 }
  0x7f   : > { %v1134_v34 = vmul.u32 18, %v1133_v0  ;;  %v1035_v42 = vmul.u32 18, %v1034_v25  ;;  %v1056_v57 = vshrl.u32 %v2990_v5, 4  ;;  %v1067_v14 = vshrl.u32 %v3007_v11, 4  ;;  %vm1230_vm12 = vmand %vm1212_vm8, %vm1194_vm6 }
  0x80   : > { %2375 = vmatmul.mubr.f32.gmra.mxu0 %v2820_v49  ;;  %v2954_v48 = vmul.u32.u64.low 3817748708, %v2938_v37  ;;  %v2955_v49 = vmul.u32.u64.high 3817748708, %v2938_v37, %v2954_v48  ;;  %v3030_v32 = vsub.s32 %v2901_v16, %v1123_v63  ;;  %v3048_v16 = vadd.s32 136, %v2881_v4  ;;  %vm3103_vm15 = vmand %vm1213_vm9, %vm1195_vm7 }
  0x81   : > { %v1248_v48 = vadd.s32 18, %v2980_v62  ;;  %v1135_v54 = vsub.s32 %v2921_v27, %v1134_v34  ;;  %v3062_v63 = vadd.s32 128, %v2881_v4  ;;  %v1036_v9 = vsub.s32 %v2935_v36, %v1035_v42 }
  0x82   : > { %v1045_v26 = vshrl.u32 %v2955_v49, 4  ;;  %3909 = vst [vmem:[#allocation9_spill] sm:$0xff] %v3048_v16  ;;  %v3054_v49 = vadd.s32 120, %v2881_v4  ;;  %vm1204_vm10 = vcmp.ne.s32.totalorder %v3030_v32, 0  ;;  %vm1222_vm11 = vcmp.lt.s32.totalorder %v3030_v32, 0 }
  0x83   : > { %v3070_v8 = vmul.u32.u64.low 3817748708, %v3048_v16  ;;  %v3071_v10 = vmul.u32.u64.high 3817748708, %v3048_v16, %v3070_v8  ;;  %v1100_v4 = vshrl.u32 %v3017_v20, 4  ;;  %v1078_v30 = vshrl.u32 %v3027_v31, 4  ;;  %vm3117_vm0 = vmand %vm1222_vm11, %vm1204_vm10 }
  0x84   : > { %v1046_v50 = vmul.u32 18, %v1045_v26  ;;  %v3076_v27 = vmul.u32.u64.low 3817748708, %v3054_v49  ;;  %v3077_v5 = vmul.u32.u64.high 3817748708, %v3054_v49, %v3076_v27  ;;  %v1155_v26 = vshrl.u32 %v3013_v15, 4 }
  0x85   : > { %v1057_v34 = vmul.u32 18, %v1056_v57  ;;  %v3093_v20 = vmul.u32.u64.low 3817748708, %v3062_v63  ;;  %v3094_v35 = vmul.u32.u64.high 3817748708, %v3062_v63, %v3093_v20  ;;  %v1089_v8 = vshrl.u32 %v3034_v40, 4 }
  0x86   : > { %v1047_v11 = vsub.s32 %v2938_v37, %v1046_v50  ;;  %vm1205_vm13 = vcmp.ne.s32.totalorder %v1135_v54, 0  ;;  %vm1223_vm14 = vcmp.lt.s32.totalorder %v1135_v54, 0  ;;  %v1145_v27 = vmul.u32 18, %v1144_v7 }
  0x87   : > { %v1068_v16 = vmul.u32 18, %v1067_v14  ;;  %v3108_v37 = vsel %vm1230_vm12, %v1248_v48, %v2980_v62  ;;  %v1258_v15 = vadd.s32 18, %v3030_v32  ;;  %v1259_v31 = vadd.s32 18, %v1135_v54  ;;  %vm3125_vm4 = vmand %vm1223_vm14, %vm1205_vm13 }
  0x88   : > { %v1101_v40 = vmul.u32 18, %v1100_v4  ;;  %vm1196_vm1 = vcmp.ne.s32.totalorder %v1036_v9, 0  ;;  %vm1214_vm2 = vcmp.lt.s32.totalorder %v1036_v9, 0  ;;  %v1156_v57 = vmul.u32 18, %v1155_v26 }
  0x89   : > { %v1079_v7 = vmul.u32 18, %v1078_v30  ;;  %vm3902_vm3 = vcmask 1040384   ;;  %vm1197_vm5 = vcmp.ne.s32.totalorder %v1047_v11, 0  ;;  %vm1215_vm6 = vcmp.lt.s32.totalorder %v1047_v11, 0  ;;  %vm1232_vm7 = vmand %vm1214_vm2, %vm1196_vm1 }
  0x8a   : > { %v3130_v14 = vsub.s32 %v2958_v51, %v1057_v34  ;;  %v1090_v4 = vmul.u32 18, %v1089_v8  ;;  %v3137_v26 = vsel %vm3103_vm15, %v1249_v39, %v2986_v2  ;;  %v1250_v30 = vadd.s32 18, %v1036_v9  ;;  %vm1233_vm8 = vmand %vm1215_vm6, %vm1197_vm5 }
  0x8b   : > { %v3146_v47 = vsel %vm3117_vm0, %v1258_v15, %v3030_v32  ;;  %v1251_v51 = vadd.s32 18, %v1047_v11  ;;  %v1166_v34 = vshrl.u32 %v3077_v5, 4  ;;  %v3152_v2 = vsub.s32 %v2974_v59, %v1101_v40 }
  0x8c   : > { %v1188_v32 = vshrl.u32 %v3071_v10, 4  ;;  %vm1198_vm9 = vcmp.ne.s32.totalorder %v3130_v14, 0  ;;  %vm1216_vm10 = vcmp.lt.s32.totalorder %v3130_v14, 0  ;;  %v1177_v59 = vshrl.u32 %v3094_v35, 4 }
  0x8d   : > { %v3175_v8 = vsel %vm1232_vm7, %v1250_v30, %v1036_v9  ;;  %v3182_v10 = vsel %vm1233_vm8, %v1251_v51, %v1047_v11  ;;  %vm1202_vm13 = vcmp.ne.s32.totalorder %v3152_v2, 0  ;;  %vm1220_vm14 = vcmp.lt.s32.totalorder %v3152_v2, 0  ;;  %vm3193_vm15 = vmand %vm1216_vm10, %vm1198_vm9 }
  0x8e   : > { %v1252_v11 = vadd.s32 18, %v3130_v14  ;;  %v1178_v15 = vmul.u32 18, %v1177_v59  ;;  %v3206_v50 = vmul.u32 18, %v1188_v32  ;;  %vm3212_vm6 = vmand %vm1220_vm14, %vm1202_vm13  ;;  %vm865_vm7 = vcmask 1046528  }
  0x8f   : > { %vm1283_vm9 = vcmp.ne.s32.totalorder %v3042_v46, 0  ;;  %vm1301_vm10 = vcmp.ne.s32.totalorder %v3042_v46, 17  ;;  %vm1302_vm13 = vcmp.ne.s32.totalorder %v3108_v37, 17  ;;  %vm1285_vm14 = vcmp.ne.s32.totalorder %v3137_v26, 0 }
  0x90   : > { %3922 = vst [vmem:[#allocation12_spill] sm:$0xff] %v3206_v50 }
  0xfe   : > { %v2893_v12 = vpop.f32.mrf.mxu0 }
  0xff   : > { %v2895_v13 = vpop.f32.mrf.mxu1 }
 0x100   : > { %v2903_v17 = vpop.f32.mrf.mxu0 }
 0x101   : > { %v2905_v18 = vpop.f32.mrf.mxu1 }
 0x102   : > { %v2912_v23 = vpop.f32.mrf.mxu0 }
 0x103   : > { %v2914_v24 = vpop.f32.mrf.mxu1  ;;  %v780_v32 = vrot.slane %v2912_v23, 7 }
 0x104   : > { %v2923_v28 = vpop.f32.mrf.mxu0 }
 0x105   : > { %v2925_v29 = vpop.f32.mrf.mxu1  ;;  %v778_v40 = vrot.slane %v2923_v28, 7 }
 0x107   : > { %v781_v9 = vsel %vm3902_vm3, %v778_v40, %v780_v32 }
 0x108   : > { %v2928_v33 = vpop.f32.mrf.mxu0  ;;  %v2940_v38 = vpop.f32.mrf.mxu1 }
 0x109   : > { %v784_v23 = vrot.slane %v2928_v33, 7 }
 0x10a   : > { %v2944_v41 = vpop.f32.mrf.mxu0  ;;  %v2946_v43 = vpop.f32.mrf.mxu1 }
 0x10b   : > { %v782_v48 = vrot.slane %v2944_v41, 7 }
 0x10d   : > { %v2960_v52 = vpop.f32.mrf.mxu0 }
 0x10e   : > { %v2962_v53 = vpop.f32.mrf.mxu1 }
 0x10f   : > { %3903 = vst [vmem:[#allocation5_spill] sm:$0xff] %v2962_v53  ;;  %v2976_v60 = vpop.f32.mrf.mxu0  ;;  %v1069_v53 = vsub.s32 %v2968_v56, %v1068_v16  ;;  %v3161_v56 = vsub.s32 %v2971_v58, %v1156_v57  ;;  %v3165_v16 = vsub.s32 %v2984_v1, %v1079_v7  ;;  %v1256_v7 = vadd.s32 18, %v3152_v2 }
 0x110   : > { %v2978_v61 = vpop.f32.mrf.mxu1  ;;  %v786_v59 = vrot.slane %v2976_v60, 7 }
 0x111   : > { %vm1199_vm11 = vcmp.ne.s32.totalorder %v1069_v53, 0  ;;  %vm1217_vm12 = vcmp.lt.s32.totalorder %v1069_v53, 0  ;;  %vm1200_vm0 = vcmp.ne.s32.totalorder %v3165_v16, 0  ;;  %vm1218_vm1 = vcmp.lt.s32.totalorder %v3165_v16, 0 }
 0x112   : > { %vm3200_vm2 = vmand %vm1217_vm12, %vm1199_vm11  ;;  %v1254_v51 = vadd.s32 18, %v3165_v16  ;;  %vm1284_vm12 = vcmp.ne.s32.totalorder %v3108_v37, 0  ;;  %v3271_v33 = vsel %vm3212_vm6, %v1256_v7, %v3152_v2  ;;  %v787_v36 = vsel %vm3902_vm3, %v784_v23, %v786_v59 }
 0x113   : > { %v3021_v22 = vpop.f32.mrf.mxu1  ;;  %vm3229_vm8 = vmand %vm1218_vm1, %vm1200_vm0  ;;  %vm1286_vm0 = vcmp.ne.s32.totalorder %v3175_v8, 0  ;;  %vm1304_vm1 = vcmp.ne.s32.totalorder %v3175_v8, 17 }
 0x114   : > { %v3019_v21 = vpop.f32.mrf.mxu0  ;;  %3906 = vst [vmem:[#allocation6_spill] sm:$0xff] %v3021_v22  ;;  %v3140_v22 = vsub.s32 %v2965_v55, %v1145_v27  ;;  %v3156_v55 = vsel %vm3125_vm4, %v1259_v31, %v1135_v54  ;;  %v1091_v54 = vsub.s32 %v2993_v6, %v1090_v4  ;;  %v1167_v27 = vmul.u32 18, %v1166_v34  ;;  %vm3379_vm6 = vmand %vm1284_vm12, %vm1302_vm13 }
 0x115   : > { %v3038_v45 = vpop.f32.mrf.mxu1  ;;  %3916 = vst [vmem:[#allocation10_spill] sm:$0xff] %v3156_v55  ;;  %v775_v6 = vrot.slane %v2903_v17, 7  ;;  %v1253_v17 = vadd.s32 18, %v1069_v53  ;;  %v776_v31 = vrot.slane %v2893_v12, 7  ;;  %vm3447_vm13 = vmand %vm1286_vm0, %vm1304_vm1  ;;  %vm1207_vm1 = vcmp.ne.s32.totalorder %v3161_v56, 0 }
 0x116   : > { %v3036_v44 = vpop.f32.mrf.mxu0  ;;  %3907 = vst [vmem:[#allocation7_spill] sm:$0xff] %v3038_v45  ;;  %v3178_v58 = vadd.s32 18, %v3140_v22  ;;  %vm1201_vm4 = vcmp.ne.s32.totalorder %v1091_v54, 0  ;;  %vm1219_vm5 = vcmp.lt.s32.totalorder %v1091_v54, 0  ;;  %v3223_v12 = vsub.s32 %v3054_v49, %v1167_v27 }
 0x117   : > { %v1255_v34 = vadd.s32 18, %v1091_v54  ;;  %v777_v41 = vsel %vm3902_vm3, %v775_v6, %v776_v31  ;;  %v3242_v49 = vsel %vm3193_vm15, %v1252_v11, %v3130_v14  ;;  %vm3246_vm11 = vmand %vm1219_vm5, %vm1201_vm4  ;;  %v3258_v50 = vsel %vm3200_vm2, %v1253_v17, %v1069_v53 }
 0x118   : > { %3917 = vst [vmem:[#allocation11_spill] sm:$0xff] %v3178_v58  ;;  %3925 = vst [vmem:[#allocation13_spill] sm:$0xff] %v3223_v12  ;;  %v828_v58 = vsel %vm3902_vm3, 0.0, %v775_v6  ;;  %v3261_v14 = vsub.s32 %v3062_v63, %v1178_v15  ;;  %v779_v11 = vsel %vm3902_vm3, %v776_v31, %v778_v40  ;;  %v3274_v53 = vadd.f32 %v2895_v13, %v777_v41 }
 0x119   : > { %v3066_v3 = vpop.f32.mrf.mxu1  ;;  %v785_v63 = vsel %vm3902_vm3, %v782_v48, %v784_v23  ;;  %vm1303_vm15 = vcmp.ne.s32.totalorder %v3137_v26, 17  ;;  %v3286_v6 = vsel %vm3246_vm11, %v1255_v34, %v1091_v54  ;;  %v829_v2 = vadd.f32 %v828_v58, %v2905_v18  ;;  %vm3350_vm5 = vmand %vm1283_vm9, %vm1301_vm10 }
 0x11a   : > { %v3064_v0 = vpop.f32.mrf.mxu0  ;;  %v783_v13 = vsel %vm3902_vm3, %v780_v32, %v782_v48  ;;  %v792_v17 = vrot.slane %v3019_v21, 7  ;;  %v3293_v15 = vadd.f32 %v2914_v24, %v781_v9  ;;  %v3296_v31 = vadd.f32 %v779_v11, %v2925_v29 }
 0x11b   : > { %v3082_v25 = vpop.f32.mrf.mxu1  ;;  %v790_v40 = vrot.slane %v3036_v44, 7  ;;  %v3303_v18 = vadd.f32 %v2940_v38, %v785_v63  ;;  %v3310_v29 = vadd.f32 %v783_v13, %v2946_v43  ;;  %v3316_v44 = vadd.f32 %v787_v36, %v2978_v61 }
 0x11c   : > { %v3080_v19 = vpop.f32.mrf.mxu0  ;;  %v796_v7 = vrot.slane %v3064_v0, 7  ;;  %vm1287_vm2 = vcmp.ne.s32.totalorder %v3182_v10, 0  ;;  %vm1305_vm4 = vcmp.ne.s32.totalorder %v3182_v10, 17  ;;  %vm1288_vm9 = vcmp.ne.s32.totalorder %v3242_v49, 0 }
 0x11d   : > { %v794_v55 = vrot.slane %v3080_v19, 7  ;;  %v3282_v19 = vsel %vm3229_vm8, %v1254_v51, %v3165_v16  ;;  %v788_v16 = vrot.slane %v2960_v52, 7  ;;  %v3326_v43 = vsel %vm3902_vm3, %v790_v40, %v792_v17  ;;  %vm3396_vm8 = vmand %vm1285_vm14, %vm1303_vm15 }
 0x11e   : > { %vm1306_vm10 = vcmp.ne.s32.totalorder %v3242_v49, 17  ;;  %vm1289_vm11 = vcmp.ne.s32.totalorder %v3258_v50, 0  ;;  %vm1307_vm12 = vcmp.ne.s32.totalorder %v3258_v50, 17  ;;  %vm1206_vm14 = vcmp.ne.s32.totalorder %v3140_v22, 0  ;;  %vm3460_vm0 = vmand %vm1287_vm2, %vm1305_vm4 }
 0x11f   : > { %v3097_v45 = vpop.f32.mrf.mxu0  ;;  %v3111_v42 = vpop.f32.mrf.mxu1  ;;  %v795_v58 = vsel %vm3902_vm3, %v792_v17, %v794_v55  ;;  %v3313_v52 = vsel %vm3902_vm3, %v786_v59, %v788_v16  ;;  %v797_v61 = vsel %vm3902_vm3, %v794_v55, %v796_v7  ;;  %v3344_v55 = vsel %vm3902_vm3, %v788_v16, %v790_v40 }
 0x120   : > { %v800_v28 = vrot.slane %v3097_v45, 7  ;;  %v839_v0 = vadd.f32 %v795_v58, %v3082_v25  ;;  %v840_v17 = vadd.f32 %v3066_v3, %v797_v61  ;;  %vm1224_vm15 = vcmp.lt.s32.totalorder %v3140_v22, 0 }
 0x121   : > { %v3121_v62 = vpop.f32.mrf.mxu0  ;;  %v3132_v20 = vpop.f32.mrf.mxu1  ;;  %vm1308_vm4 = vcmp.ne.s32.totalorder %v3282_v19, 17  ;;  %vm1310_vm2 = vcmp.ne.s32.totalorder %v3271_v33, 17 }
 0x122   : > { %v798_v21 = vrot.slane %v3121_v62, 7 }
 0x124   : > { %v801_v59 = vsel %vm3902_vm3, %v798_v21, %v800_v28  ;;  %v799_v27 = vsel %vm3902_vm3, %v796_v7, %v798_v21 }
 0x125   : > { %v3167_v39 = vpop.f32.mrf.mxu0  ;;  %v3173_v5 = vpop.f32.mrf.mxu1  ;;  %v3360_v46 = vadd.f32 %v3111_v42, %v801_v59 }
 0x127   : > { %v3180_v1 = vpop.f32.mrf.mxu0  ;;  %v3187_v35 = vpop.f32.mrf.mxu1 }
 0x128   : > { %v802_v41 = vrot.slane %v3180_v1, 7 }
 0x12a   : > { %v3218_v4 = vpop.f32.mrf.mxu0  ;;  %v803_v58 = vsel %vm3902_vm3, %v800_v28, %v802_v41 }
 0x12b   : > { %v3220_v30 = vpop.f32.mrf.mxu1  ;;  %v808_v3 = vrot.slane %v3218_v4, 7 }
 0x12c   : > { %v3252_v60 = vpop.f32.mrf.mxu0 }
 0x12d   : > { %v3254_v12 = vpop.f32.mrf.mxu1  ;;  %v806_v21 = vrot.slane %v3252_v60, 7 }
 0x12f   : > { %v809_v37 = vsel %vm3902_vm3, %v806_v21, %v808_v3 }
 0x130   : > { %v2364_v54 = vpop.f32.mrf.mxu0 }
 0x131   : > { %v3300_v57 = vpop.f32.mrf.mxu1  ;;  %v867_v62 = vrot.slane %v2364_v54, 1  ;;  %v841_v54 = vadd.f32 %v799_v27, %v3132_v20 }
 0x132   : > { %v887_v24 = vrot.slane %v3300_v57, 1  ;;  %v667_v38 = vpop.f32.mrf.mxu0  ;;  %v804_v57 = vrot.slane %v3167_v39, 7 }
 0x133   : > { %v3319_v48 = vpop.f32.mrf.mxu1  ;;  %v866_v51 = vrot.slane %v667_v38, 1 }
 0x134   : > { %v885_v34 = vrot.slane %v3319_v48, 1  ;;  %v3331_v32 = vpop.f32.mrf.mxu0  ;;  %v1261_v48 = vadd.s32 18, %v3161_v56 }
 0x135   : > { %v3333_v45 = vpop.f32.mrf.mxu1  ;;  %v868_v23 = vsel %vm865_vm7, %v866_v51, %v867_v62 }
 0x136   : > { %v888_v25 = vsel %vm865_vm7, %v885_v34, %v887_v24  ;;  %v920_v1 = vadd.f32 %v868_v23, %v829_v2  ;;  %v891_v63 = vrot.slane %v3333_v45, 1  ;;  %v677_v13 = vpop.f32.mrf.mxu0  ;;  %v871_v2 = vrot.slane %v3331_v32, 1 }
 0x137   : > { %v3354_v11 = vadd.f32 %v888_v25, %v839_v0  ;;  %v727_v36 = vpop.f32.mrf.mxu1  ;;  %v869_v16 = vrot.slane %v677_v13, 1 }
 0x138   : > { %v889_v40 = vrot.slane %v727_v36, 1  ;;  %940 = vst [vmem:[%s3367_s23] sm:$0xff] %v920_v1  ;;  %958 = vst [vmem:[%s2656_s29] sm:$0xff] %v920_v1  ;;  %v3383_v42 = vpop.f32.mrf.mxu0  ;;  %v1337_v7 = vsel %vm3350_vm5, %v920_v1, 0.0  ;;  %v805_v36 = vsel %vm3902_vm3, %v802_v41, %v804_v57  ;;  %vm1225_vm5 = vcmp.lt.s32.totalorder %v3161_v56, 0 }
 0x139   : > { %950 = vst [vmem:[%s3367_s23 + $0x50] sm:$0xff] %v3354_v11  ;;  %968 = vst [vmem:[%s2656_s29 + $0x50] sm:$0xff] %v3354_v11  ;;  %v3385_v20 = vpop.f32.mrf.mxu1  ;;  %v870_v38 = vsel %vm865_vm7, %v867_v62, %v869_v16  ;;  %v872_v28 = vsel %vm865_vm7, %v869_v16, %v871_v2 }
 0x13a   : > { %v921_v62 = vadd.f32 %v870_v38, %v3274_v53  ;;  %v922_v51 = vadd.f32 %v872_v28, %v3296_v31  ;;  %v890_v61 = vsel %vm865_vm7, %v887_v24, %v889_v40  ;;  %v892_v26 = vsel %vm865_vm7, %v889_v40, %v891_v63  ;;  %v687_v0 = vpop.f32.mrf.mxu0 }
 0x13b   : > { %v737_v32 = vpop.f32.mrf.mxu1  ;;  %v3410_v59 = vadd.f32 %v890_v61, %v840_v17  ;;  %v3412_v27 = vadd.f32 %v892_v26, %v841_v54  ;;  %v875_v53 = vrot.slane %v3383_v42, 1  ;;  %v895_v31 = vrot.slane %v3385_v20, 1  ;;  %v3946_v20 = vld [vmem:[#allocation5_spill] sm:$0xff] }
 0x13c   : > { %941 = vst [vmem:[%s3367_s23 + $0x8] sm:$0xff] %v921_v62  ;;  %942 = vst [vmem:[%s3367_s23 + $0x10] sm:$0xff] %v922_v51  ;;  %v1338_v24 = vsel %vm3379_vm6, %v921_v62, 0.0  ;;  %v1339_v23 = vsel %vm3396_vm8, %v922_v51, 0.0  ;;  %v873_v25 = vrot.slane %v687_v0, 1  ;;  %v893_v9 = vrot.slane %v737_v32, 1  ;;  %v3424_v13 = vpop.f32.mrf.mxu0 }
 0x13d   : > { %959 = vst [vmem:[%s2656_s29 + $0x8] sm:$0xff] %v921_v62  ;;  %960 = vst [vmem:[%s2656_s29 + $0x10] sm:$0xff] %v922_v51  ;;  %v1378_v17 = vmul.f32 %v1337_v7, %v920_v1  ;;  %v1355_v16 = vadd.f32 %v1338_v24, %v1337_v7  ;;  %v1379_v40 = vmul.f32 %v1338_v24, %v921_v62  ;;  %vm1291_vm6 = vcmp.ne.s32.totalorder %v3286_v6, 0 }
 0x13e   : > { %951 = vst [vmem:[%s3367_s23 + $0x58] sm:$0xff] %v3410_v59  ;;  %952 = vst [vmem:[%s3367_s23 + $0x60] sm:$0xff] %v3412_v27  ;;  %v843_v54 = vadd.f32 %v803_v58, %v3187_v35  ;;  %v874_v38 = vsel %vm865_vm7, %v871_v2, %v873_v25  ;;  %v876_v41 = vsel %vm865_vm7, %v873_v25, %v875_v53  ;;  %v3453_v35 = vpop.f32.mrf.mxu1  ;;  %v697_v4 = vpop.f32.mrf.mxu0  ;;  %vm1309_vm8 = vcmp.ne.s32.totalorder %v3286_v6, 17 }
 0x13f   : > { %969 = vst [vmem:[%s2656_s29 + $0x58] sm:$0xff] %v3410_v59  ;;  %970 = vst [vmem:[%s2656_s29 + $0x60] sm:$0xff] %v3412_v27  ;;  %v1356_v2 = vadd.f32 %v1355_v16, %v1339_v23  ;;  %v1380_v58 = vmul.f32 %v1339_v23, %v922_v51  ;;  %v1396_v7 = vadd.f32 %v1379_v40, %v1378_v17  ;;  %v899_v24 = vrot.slane %v3453_v35, 1  ;;  %v3940_v16 = vld [vmem:[#allocation8_spill] sm:$0xff] }
 0x140   : > { %v923_v28 = vadd.f32 %v874_v38, %v3293_v15  ;;  %v924_v15 = vadd.f32 %v876_v41, %v3310_v29  ;;  %v894_v10 = vsel %vm865_vm7, %v891_v63, %v893_v9  ;;  %v896_v62 = vsel %vm865_vm7, %v893_v9, %v895_v31  ;;  %v3476_v51 = vpop.f32.mrf.mxu0 }
 0x141   : > { %v1397_v61 = vadd.f32 %v1396_v7, %v1380_v58  ;;  %v3485_v45 = vadd.f32 %v894_v10, %v3360_v46  ;;  %v3487_v63 = vadd.f32 %v896_v62, %v843_v54  ;;  %v747_v46 = vpop.f32.mrf.mxu1  ;;  %v844_v23 = vadd.f32 %v3173_v5, %v805_v36  ;;  %v3947_v58 = vld [vmem:[#allocation6_spill] sm:$0xff] }
 0x142   : > { %943 = vst [vmem:[%s3367_s23 + $0x18] sm:$0xff] %v923_v28  ;;  %961 = vst [vmem:[%s2656_s29 + $0x18] sm:$0xff] %v923_v28  ;;  %v1340_v29 = vsel %vm3447_vm13, %v923_v28, 0.0  ;;  %v1341_v26 = vsel %vm3460_vm0, %v924_v15, 0.0  ;;  %v807_v25 = vsel %vm3902_vm3, %v804_v57, %v806_v21  ;;  %v879_v9 = vrot.slane %v3424_v13, 1  ;;  %v707_v36 = vpop.f32.mrf.mxu0 }
 0x143   : > { %944 = vst [vmem:[%s3367_s23 + $0x20] sm:$0xff] %v924_v15  ;;  %962 = vst [vmem:[%s2656_s29 + $0x20] sm:$0xff] %v924_v15  ;;  %v1357_v0 = vadd.f32 %v1356_v2, %v1340_v29  ;;  %v1381_v32 = vmul.f32 %v1340_v29, %v923_v28  ;;  %v877_v17 = vrot.slane %v697_v4, 1  ;;  %vm1311_vm13 = vcmp.ne.s32.totalorder %v3940_v16, 17  ;;  %v3945_v2 = vld [vmem:[#allocation10_spill] sm:$0xff] }
 0x144   : > { %953 = vst [vmem:[%s3367_s23 + $0x68] sm:$0xff] %v3485_v45  ;;  %954 = vst [vmem:[%s3367_s23 + $0x70] sm:$0xff] %v3487_v63  ;;  %v1382_v60 = vmul.f32 %v1341_v26, %v924_v15  ;;  %v846_v57 = vadd.f32 %v3220_v30, %v809_v37  ;;  %v919_v13 = vsel %vm865_vm7, %v899_v24, 0.0  ;;  %v897_v49 = vrot.slane %v747_v46, 1  ;;  %v3950_v15 = vld [vmem:[#allocation7_spill] sm:$0xff] }
 0x145   : > { %971 = vst [vmem:[%s2656_s29 + $0x68] sm:$0xff] %v3485_v45  ;;  %972 = vst [vmem:[%s2656_s29 + $0x70] sm:$0xff] %v3487_v63  ;;  %v1358_v5 = vadd.f32 %v1357_v0, %v1341_v26  ;;  %v1398_v39 = vadd.f32 %v1397_v61, %v1381_v32  ;;  %v878_v40 = vsel %vm865_vm7, %v875_v53, %v877_v17  ;;  %v883_v1 = vrot.slane %v3476_v51, 1  ;;  %v3956_v32 = vld [vmem:[#allocation12_spill] sm:$0xff] }
 0x146   : > { %vm3520_vm3 = vmand %vm1288_vm9, %vm1306_vm10  ;;  %v880_v54 = vsel %vm865_vm7, %v877_v17, %v879_v9  ;;  %vm1294_vm9 = vcmp.ne.s32.totalorder %v3146_v47, 0  ;;  %vm1312_vm10 = vcmp.ne.s32.totalorder %v3146_v47, 17  ;;  %v3539_v53 = vadd.f32 %v919_v13, %v846_v57 }
 0x147   : > { %vm3533_vm0 = vmand %vm1289_vm11, %vm1307_vm12  ;;  %v1399_v42 = vadd.f32 %v1398_v39, %v1382_v60  ;;  %v925_v50 = vadd.f32 %v878_v40, %v3303_v18  ;;  %v926_v3 = vadd.f32 %v880_v54, %v3316_v44  ;;  %v898_v38 = vsel %vm865_vm7, %v895_v31, %v897_v49 }
 0x148   : > { %v900_v41 = vsel %vm865_vm7, %v897_v49, %v899_v24  ;;  %v881_v35 = vrot.slane %v707_v36, 1  ;;  %v845_v4 = vadd.f32 %v807_v25, %v3254_v12  ;;  %vm1313_vm12 = vcmp.ne.s32.totalorder %v3945_v2, 17  ;;  %957 = vst [vmem:[%s3367_s23 + $0x88] sm:$0xff] %v3539_v53  ;;  %975 = vst [vmem:[%s2656_s29 + $0x88] sm:$0xff] %v3539_v53 }
 0x149   : > { %945 = vst [vmem:[%s3367_s23 + $0x28] sm:$0xff] %v925_v50  ;;  %946 = vst [vmem:[%s3367_s23 + $0x30] sm:$0xff] %v926_v3  ;;  %v1342_v18 = vsel %vm3520_vm3, %v925_v50, 0.0  ;;  %v1343_v12 = vsel %vm3533_vm0, %v926_v3, 0.0  ;;  %v3563_v44 = vadd.f32 %v898_v38, %v844_v23  ;;  %v836_v31 = vadd.f32 %v3946_v20, %v3313_v52 }
 0x14a   : > { %963 = vst [vmem:[%s2656_s29 + $0x28] sm:$0xff] %v925_v50  ;;  %964 = vst [vmem:[%s2656_s29 + $0x30] sm:$0xff] %v926_v3  ;;  %v838_v7 = vadd.f32 %v3947_v58, %v3326_v43  ;;  %v1359_v8 = vadd.f32 %v1358_v5, %v1342_v18  ;;  %v1383_v37 = vmul.f32 %v1342_v18, %v925_v50  ;;  %v3964_v5 = vld [vmem:[#allocation11_spill] sm:$0xff]  ;;  %v1263_v40 = vadd.s32 18, %v3261_v14 }
 0x14b   : > { %vm3573_vm11 = vmand %vm1224_vm15, %vm1206_vm14  ;;  %v837_v10 = vadd.f32 %v3344_v55, %v3950_v15  ;;  %v3587_v43 = vadd.f32 %v900_v41, %v845_v4  ;;  %955 = vst [vmem:[%s3367_s23 + $0x78] sm:$0xff] %v3563_v44  ;;  %v886_v62 = vsel %vm865_vm7, %v883_v1, %v885_v34  ;;  %v882_v55 = vsel %vm865_vm7, %v879_v9, %v881_v35  ;;  %v3957_v34 = vld [vmem:[#allocation9_spill] sm:$0xff] }
 0x14c   : > { %vm3583_vm3 = vmand %vm1225_vm5, %vm1207_vm1  ;;  %973 = vst [vmem:[%s2656_s29 + $0x78] sm:$0xff] %v3563_v44  ;;  %v1360_v51 = vadd.f32 %v1359_v8, %v1343_v12  ;;  %v1384_v61 = vmul.f32 %v1343_v12, %v926_v3  ;;  %v1400_v29 = vadd.f32 %v1399_v42, %v1383_v37  ;;  %v929_v26 = vadd.f32 %v886_v62, %v838_v7  ;;  %v3960_v9 = vld [vmem:[#allocation13_spill] sm:$0xff] }
 0x14d   : > { %vm3953_vm14 = vcmp.ne.s32.totalorder %v3282_v19, 0  ;;  %v1190_v24 = vsub.s32 %v3957_v34, %v3956_v32  ;;  %956 = vst [vmem:[%s3367_s23 + $0x80] sm:$0xff] %v3587_v43  ;;  %974 = vst [vmem:[%s2656_s29 + $0x80] sm:$0xff] %v3587_v43  ;;  %v884_v46 = vsel %vm865_vm7, %v881_v35, %v883_v1  ;;  %v927_v23 = vadd.f32 %v882_v55, %v836_v31 }
 0x14e   : > { %vm3601_vm15 = vmand %vm3953_vm14, %vm1308_vm4  ;;  %v1401_v25 = vadd.f32 %v1400_v29, %v1384_v61  ;;  %vm1208_vm5 = vcmp.ne.s32.totalorder %v3960_v9, 0  ;;  %vm1226_vm4 = vcmp.lt.s32.totalorder %v3960_v9, 0  ;;  %949 = vst [vmem:[%s3367_s23 + $0x48] sm:$0xff] %v929_v26  ;;  %vm3961_vm7 = vcmp.ne.s32.totalorder %v3271_v33, 0 }
 0x14f   : > { %vm3617_vm1 = vmand %vm1291_vm6, %vm1309_vm8  ;;  %967 = vst [vmem:[%s2656_s29 + $0x48] sm:$0xff] %v929_v26  ;;  %v928_v6 = vadd.f32 %v884_v46, %v837_v10  ;;  %v1278_v60 = vsel %vm3573_vm11, %v3964_v5, %v3140_v22  ;;  %vm1209_vm6 = vcmp.ne.s32.totalorder %v3261_v14, 0  ;;  %v1262_v39 = vadd.s32 18, %v3960_v9 }
 0x150   : > { %vm3629_vm0 = vmand %vm3961_vm7, %vm1310_vm2  ;;  %947 = vst [vmem:[%s3367_s23 + $0x38] sm:$0xff] %v927_v23  ;;  %v1344_v57 = vsel %vm3601_vm15, %v927_v23, 0.0  ;;  %vm3965_vm2 = vcmp.ne.s32.totalorder %v3940_v16, 0  ;;  %vm1227_vm14 = vcmp.lt.s32.totalorder %v3261_v14, 0  ;;  %v1279_v13 = vsel %vm3583_vm3, %v1261_v48, %v3161_v56 }
 0x151   : > { %965 = vst [vmem:[%s2656_s29 + $0x38] sm:$0xff] %v927_v23  ;;  %vm3647_vm8 = vmand %vm3965_vm2, %vm1311_vm13  ;;  %v1345_v22 = vsel %vm3617_vm1, %v928_v6, 0.0  ;;  %v1361_v21 = vadd.f32 %v1360_v51, %v1344_v57  ;;  %v1385_v36 = vmul.f32 %v1344_v57, %v927_v23  ;;  %vm1210_vm11 = vcmp.ne.s32.totalorder %v1190_v24, 0 }
 0x152   : > { %948 = vst [vmem:[%s3367_s23 + $0x40] sm:$0xff] %v928_v6  ;;  %966 = vst [vmem:[%s2656_s29 + $0x40] sm:$0xff] %v928_v6  ;;  %vm1228_vm15 = vcmp.lt.s32.totalorder %v1190_v24, 0  ;;  %v1346_v16 = vsel %vm3629_vm0, %v929_v26, 0.0  ;;  %v1386_v30 = vmul.f32 %v1345_v22, %v928_v6  ;;  %v1347_v49 = vsel %vm3647_vm8, %v3354_v11, 0.0 }
 0x153   : > { %vm1244_vm13 = vmand %vm1226_vm4, %vm1208_vm5  ;;  %v1362_v54 = vadd.f32 %v1361_v21, %v1345_v22  ;;  %v1402_v56 = vadd.f32 %v1401_v25, %v1385_v36  ;;  %vm1296_vm3 = vcmp.ne.s32.totalorder %v1278_v60, 0  ;;  %vm1314_vm7 = vcmp.ne.s32.totalorder %v1278_v60, 17 }
 0x154   : > { %vm1330_vm1 = vmand %vm1294_vm9, %vm1312_vm10  ;;  %v1264_v42 = vadd.s32 18, %v1190_v24  ;;  %vm3968_vm9 = vcmp.ne.s32.totalorder %v3945_v2, 0  ;;  %v1280_v47 = vsel %vm1244_vm13, %v1262_v39, %v3960_v9  ;;  %v1387_v50 = vmul.f32 %v1346_v16, %v929_v26 }
 0x155   : > { %vm1245_vm5 = vmand %vm1227_vm14, %vm1209_vm6  ;;  %v1363_v3 = vadd.f32 %v1362_v54, %v1346_v16  ;;  %v1403_v38 = vadd.f32 %v1402_v56, %v1386_v30  ;;  %v1348_v41 = vsel %vm1330_vm1, %v3410_v59, 0.0  ;;  %vm1297_vm4 = vcmp.ne.s32.totalorder %v1279_v13, 0 }
 0x156   : > { %vm1331_vm10 = vmand %vm3968_vm9, %vm1313_vm12  ;;  %vm1315_vm0 = vcmp.ne.s32.totalorder %v1279_v13, 17  ;;  %v1388_v1 = vmul.f32 %v1347_v49, %v3354_v11  ;;  %v1281_v35 = vsel %vm1245_vm5, %v1263_v40, %v3261_v14  ;;  %vm1298_vm12 = vcmp.ne.s32.totalorder %v1280_v47, 0 }
 0x157   : > { %vm1246_vm2 = vmand %vm1228_vm15, %vm1210_vm11  ;;  %v1364_v4 = vadd.f32 %v1363_v3, %v1347_v49  ;;  %v1404_v2 = vadd.f32 %v1403_v38, %v1387_v50  ;;  %v1349_v18 = vsel %vm1331_vm10, %v3412_v27, 0.0  ;;  %vm1316_vm8 = vcmp.ne.s32.totalorder %v1280_v47, 17 }
 0x158   : > { %vm1332_vm6 = vmand %vm1296_vm3, %vm1314_vm7  ;;  %v1389_v12 = vmul.f32 %v1348_v41, %v3410_v59  ;;  %v1282_v20 = vsel %vm1246_vm2, %v1264_v42, %v1190_v24  ;;  %vm1299_vm11 = vcmp.ne.s32.totalorder %v1281_v35, 0  ;;  %vm1317_vm15 = vcmp.ne.s32.totalorder %v1281_v35, 17 }
 0x159   : > { %vm1333_vm14 = vmand %vm1297_vm4, %vm1315_vm0  ;;  %v1365_v31 = vadd.f32 %v1364_v4, %v1348_v41  ;;  %v1405_v58 = vadd.f32 %v1404_v2, %v1388_v1  ;;  %v1350_v7 = vsel %vm1332_vm6, %v3485_v45, 0.0  ;;  %v1390_v11 = vmul.f32 %v1349_v18, %v3412_v27 }
 0x15a   : > { %vm1334_vm13 = vmand %vm1298_vm12, %vm1316_vm8  ;;  %v1351_v8 = vsel %vm1333_vm14, %v3487_v63, 0.0  ;;  %vm1300_vm1 = vcmp.ne.s32.totalorder %v1282_v20, 0  ;;  %vm1318_vm3 = vcmp.ne.s32.totalorder %v1282_v20, 17  ;;  %v1391_v37 = vmul.f32 %v1350_v7, %v3485_v45 }
 0x15b   : > { %v1366_v14 = vadd.f32 %v1365_v31, %v1349_v18  ;;  %v1406_v28 = vadd.f32 %v1405_v58, %v1389_v12  ;;  %vm1335_vm7 = vmand %vm1299_vm11, %vm1317_vm15  ;;  %v1352_v10 = vsel %vm1334_vm13, %v3563_v44, 0.0  ;;  %v1392_v52 = vmul.f32 %v1351_v8, %v3487_v63 }
 0x15c   : > { %vm1336_vm5 = vmand %vm1300_vm1, %vm1318_vm3  ;;  %v1353_v27 = vsel %vm1335_vm7, %v3587_v43, 0.0  ;;  %v1393_v51 = vmul.f32 %v1352_v10, %v3563_v44  ;;  %vm3969_vm9 = vcmask 1040384  }
 0x15d   : > { %v1367_v59 = vadd.f32 %v1366_v14, %v1350_v7  ;;  %v1407_v15 = vadd.f32 %v1406_v28, %v1390_v11  ;;  %v1354_v26 = vsel %vm1336_vm5, %v3539_v53, 0.0  ;;  %v1394_v45 = vmul.f32 %v1353_v27, %v3587_v43  ;;  %v1419_v43 = vld [vmem:[#allocation3] sm:$0x3] }
 0x15e   : > { %v1395_v32 = vmul.f32 %v1354_v26, %v3539_v53 }
 0x15f   : > { %v1368_v62 = vadd.f32 %v1367_v59, %v1351_v8  ;;  %v1408_v55 = vadd.f32 %v1407_v15, %v1391_v37 }
 0x161   : > { %v1369_v61 = vadd.f32 %v1368_v62, %v1352_v10  ;;  %v1409_v29 = vadd.f32 %v1408_v55, %v1392_v52 }
 0x163   : > { %v1370_v0 = vadd.f32 %v1369_v61, %v1353_v27  ;;  %v1410_v48 = vadd.f32 %v1409_v29, %v1393_v51 }
 0x165   : > { %v1371_v34 = vadd.f32 %v1370_v0, %v1354_v26  ;;  %v1411_v24 = vadd.f32 %v1410_v48, %v1394_v45 }
 0x167   : > { %v1372_v63 = vrot.slane %v1371_v34, 4  ;;  %v1412_v46 = vadd.f32 %v1411_v24, %v1395_v32 }
 0x169   : > { %v1373_v23 = vadd.f32 %v1372_v63, %v1371_v34  ;;  %v1413_v19 = vrot.slane %v1412_v46, 4 }
 0x16b   : > { %v1374_v25 = vrot.slane %v1373_v23, 2  ;;  %v1414_v9 = vadd.f32 %v1413_v19, %v1412_v46 }
 0x16d   : > { %v1375_v17 = vadd.f32 %v1374_v25, %v1373_v23  ;;  %v1415_v44 = vrot.slane %v1414_v9, 2 }
 0x16f   : > { %v1376_v6 = vrot.slane %v1375_v17, 1  ;;  %v1416_v5 = vadd.f32 %v1415_v44, %v1414_v9 }
 0x171   : > { %v1417_v60 = vrot.slane %v1416_v5, 1  ;;  %v1377_v39 = vadd.f32 %v1376_v6, %v1375_v17 }
 0x173   : > { %v1418_v57 = vadd.f32 %v1417_v60, %v1416_v5 }
 0x175   : > { %v1420_v33 = vsel %vm3969_vm9, %v1377_v39, %v1418_v57 }
 0x176   : > { %v1421_v22 = vadd.f32 %v1420_v33, %v1419_v43 }
 0x178   : > { %1422 = vst [vmem:[#allocation3] sm:$0x3] %v1421_v22 }
 0x179 PF: > { %p1423_p10 = scmp.eq.s32.totalorder %s2565_s16, 1 }
 0x17b   : > { %p1424_p11 = pnand %p1423_p10, %p214_p6 }
 0x17d   : > { %1427 = sbr.rel (%p1424_p11) target bundleno = 658 (0x292), region = 48 }
 0x182   : > { %v1428_v53 = vlaneseq  ;;  %v2580_v21 = vmov 0.0   ;;  %vm2581_vm10 = vmmov 0   ;;  %v2582_v41 = vmov 1.0   ;;  %v1699_v27 = vld [vmem:[#allocation3] sm:$0x3] }
 0x183   : > { %2389 = vmatprep.subr.mxu0 %v2580_v21  ;;  %2421 = vmatprep.mubr.msk.f32.mxu0 %vm2581_vm10, %v2580_v21  ;;  %v2583_v34 = vmov 1966171168   ;;  %v1777_v9 = vld [vmem:[%s3895_s2] sm:$0x1] }
 0x184   : > { %v3706_v36 = vshrl.u32 %v1428_v53, 7  ;;  %v1638_v13 = vand.u32 127, %v1428_v53  ;;  %v1782_v24 = vunpack.c.l.s4 %v2583_v34  ;;  %v1798_v6 = vld [vmem:[%s3896_s3] sm:$0x1] }
 0x186   : > { %v1444_v16 = vadd.s32 120, %v3706_v36  ;;  %v3709_v40 = vand.u32 7, %v1638_v13  ;;  %v1443_v54 = vadd.s32 112, %v3706_v36  ;;  %v1442_v30 = vadd.s32 104, %v3706_v36 }
 0x187   : > { %v1441_v56 = vadd.s32 96, %v3706_v36  ;;  %v1440_v50 = vadd.s32 88, %v3706_v36  ;;  %v1439_v38 = vadd.s32 80, %v3706_v36  ;;  %v1438_v35 = vadd.s32 72, %v3706_v36 }
 0x188   : > { %v1554_v49 = vand.u32 7, %v1444_v16  ;;  %v1547_v42 = vand.u32 7, %v1443_v54  ;;  %v1540_v47 = vand.u32 7, %v1442_v30  ;;  %v1437_v2 = vadd.s32 64, %v3706_v36 }
 0x189   : > { %v1533_v3 = vand.u32 7, %v1441_v56  ;;  %v1526_v1 = vand.u32 7, %v1440_v50  ;;  %v1519_v4 = vand.u32 7, %v1439_v38  ;;  %v1512_v18 = vand.u32 7, %v1438_v35 }
 0x18a   : > { %vm1666_vm4 = vcmp.eq.s32.totalorder %v1554_v49, %v3709_v40  ;;  %vm1665_vm0 = vcmp.eq.s32.totalorder %v1547_v42, %v3709_v40  ;;  %vm1664_vm2 = vcmp.eq.s32.totalorder %v1540_v47, %v3709_v40  ;;  %v1436_v12 = vadd.s32 56, %v3706_v36 }
 0x18b   : > { %2390 = vmatpush3.msk.msra.mxu0 %vm1666_vm4, %v2582_v41  ;;  %vm1663_vm6 = vcmp.eq.s32.totalorder %v1533_v3, %v3709_v40  ;;  %vm1662_vm12 = vcmp.eq.s32.totalorder %v1526_v1, %v3709_v40  ;;  %vm1661_vm8 = vcmp.eq.s32.totalorder %v1519_v4, %v3709_v40  ;;  %v1505_v20 = vand.u32 7, %v1437_v2 }
 0x18c   : > { %2391 = vmatprep.subr.mxu0 %v2580_v21  ;;  %v1435_v31 = vadd.s32 48, %v3706_v36  ;;  %vm1660_vm14 = vcmp.eq.s32.totalorder %v1512_v18, %v3709_v40  ;;  %v1498_v58 = vand.u32 7, %v1436_v12  ;;  %v1434_v7 = vadd.s32 40, %v3706_v36 }
 0x18d   : > { %2392 = vmatpush3.msk.msra.mxu0 %vm1665_vm0, %v2582_v41  ;;  %vm1659_vm11 = vcmp.eq.s32.totalorder %v1505_v20, %v3709_v40  ;;  %v1433_v14 = vadd.s32 32, %v3706_v36  ;;  %v1432_v8 = vadd.s32 24, %v3706_v36  ;;  %v1431_v59 = vadd.s32 16, %v3706_v36 }
 0x18e   : > { %2393 = vmatprep.subr.mxu0 %v2580_v21  ;;  %v1491_v11 = vand.u32 7, %v1435_v31  ;;  %vm1658_vm15 = vcmp.eq.s32.totalorder %v1498_v58, %v3709_v40  ;;  %v1484_v28 = vand.u32 7, %v1434_v7  ;;  %v1430_v10 = vadd.s32 8, %v3706_v36 }
 0x18f   : > { %2394 = vmatpush3.msk.msra.mxu0 %vm1664_vm2, %v2582_v41  ;;  %v1477_v37 = vand.u32 7, %v1433_v14  ;;  %v1470_v15 = vand.u32 7, %v1432_v8  ;;  %v1463_v52 = vand.u32 7, %v1431_v59  ;;  %v1449_v55 = vand.u32 7, %v3706_v36 }
 0x190   : > { %2395 = vmatprep.subr.mxu0 %v2580_v21  ;;  %vm1657_vm13 = vcmp.eq.s32.totalorder %v1491_v11, %v3709_v40  ;;  %vm1656_vm1 = vcmp.eq.s32.totalorder %v1484_v28, %v3709_v40  ;;  %v1456_v62 = vand.u32 7, %v1430_v10  ;;  %v1783_v63 = vunpack.c.0.s8 %v1782_v24 }
 0x191   : > { %2396 = vmatpush3.msk.msra.mxu0 %vm1663_vm6, %v2582_v41  ;;  %vm1655_vm3 = vcmp.eq.s32.totalorder %v1477_v37, %v3709_v40  ;;  %vm1654_vm7 = vcmp.eq.s32.totalorder %v1470_v15, %v3709_v40  ;;  %vm1653_vm5 = vcmp.eq.s32.totalorder %v1463_v52, %v3709_v40  ;;  %vm1651_vm10 = vcmp.eq.s32.totalorder %v1449_v55, %v3709_v40 }
 0x192   : > { %2397 = vmatprep.subr.mxu0 %v2580_v21  ;;  %vm1652_vm9 = vcmp.eq.s32.totalorder %v1456_v62, %v3709_v40  ;;  %v1786_v46 = vsub.s32 %v1783_v63, %v3706_v36 }
 0x193   : > { %2398 = vmatpush3.msk.msra.mxu0 %vm1662_vm12, %v2582_v41 }
 0x194   : > { %2399 = vmatprep.subr.mxu0 %v2580_v21 }
 0x195   : > { %2400 = vmatpush3.msk.msra.mxu0 %vm1661_vm8, %v2582_v41 }
 0x196   : > { %2401 = vmatprep.subr.mxu0 %v2580_v21 }
 0x197   : > { %2402 = vmatpush3.msk.msra.mxu0 %vm1660_vm14, %v2582_v41 }
 0x198   : > { %2403 = vmatprep.subr.mxu0 %v2580_v21 }
 0x199   : > { %2404 = vmatpush3.msk.msra.mxu0 %vm1659_vm11, %v2582_v41 }
 0x19a   : > { %2405 = vmatprep.subr.mxu0 %v2580_v21 }
 0x19b   : > { %2406 = vmatpush3.msk.msra.mxu0 %vm1658_vm15, %v2582_v41 }
 0x19c   : > { %2407 = vmatprep.subr.mxu0 %v2580_v21 }
 0x19d   : > { %2408 = vmatpush3.msk.msra.mxu0 %vm1657_vm13, %v2582_v41 }
 0x19e   : > { %2409 = vmatprep.subr.mxu0 %v2580_v21 }
 0x19f   : > { %2410 = vmatpush3.msk.msra.mxu0 %vm1656_vm1, %v2582_v41 }
 0x1a0   : > { %2411 = vmatprep.subr.mxu0 %v2580_v21 }
 0x1a1   : > { %2412 = vmatpush3.msk.msra.mxu0 %vm1655_vm3, %v2582_v41 }
 0x1a2   : > { %2413 = vmatprep.subr.mxu0 %v2580_v21 }
 0x1a3   : > { %2414 = vmatpush3.msk.msra.mxu0 %vm1654_vm7, %v2582_v41 }
 0x1a4   : > { %2415 = vmatprep.subr.mxu0 %v2580_v21 }
 0x1a5   : > { %2416 = vmatpush3.msk.msra.mxu0 %vm1653_vm5, %v2582_v41 }
 0x1a6   : > { %2417 = vmatprep.subr.mxu0 %v2580_v21 }
 0x1a7   : > { %2418 = vmatpush3.msk.msra.mxu0 %vm1652_vm9, %v2582_v41 }
 0x1a8   : > { %2419 = vmatprep.subr.mxu0 %v2580_v21 }
 0x1a9   : > { %2420 = vmatpush3.msk.msra.mxu0 %vm1651_vm10, %v2582_v41 }
 0x1aa   : > { %2422 = vmatmul.mubr.f32.vlgmr.msra.gmra.mxu0 %v1699_v27 }
 0x26a   : > { %v1766_v51 = vpop.f32.mrf.mxu0 }
 0x26b   : > { %v1770_v61 = vmul.f32 0.00024414063, %v1766_v51 }
 0x26c   : > { %v2423_v29 = vpop.f32.mrf.mxu0 }
 0x26d   : > { %v1771_v26 = vmul.f32 %v1770_v61, %v1770_v61 }
 0x26f   : > { %v1773_v45 = vrot.slane %v1771_v26, 7 }
 0x271   : > { %v1775_v0 = vsub.f32 %v1770_v61, %v1773_v45 }
 0x273   : > { %v1776_v48 = vmax.f32 %v1775_v0, 0.0 }
 0x275   : > { %v1778_v32 = vadd.f32 1e-05, %v1776_v48 }
 0x277   : > { %2537 = vrsqrt.f32 %v1778_v32 }
 0x284   : > { %v2538_v23 = vpop.eup %2537 }
 0x285   : > { %v1787_v19 = vrot.slane %v2538_v23, %v1786_v46 }
 0x287   : > { %v1788_v25 = vcombine.high %v1787_v19, %v1787_v19 }
 0x289   : > { %v1795_v17 = vrot.slane %v1788_v25, %v1786_v46 }
 0x28b   : > { %v1797_v44 = vmul.f32 %v1795_v17, %v1777_v9 }
 0x28d   : > { %v1799_v5 = vmul.f32 %v1797_v44, %v1770_v61  ;;  %1801 = vst [vmem:[#allocation4] sm:$0x1] %v1797_v44 }
 0x28f   : > { %v1800_v60 = vsub.f32 %v1798_v6, %v1799_v5 }
 0x291   : > { %1802 = vst [vmem:[#allocation4 + $0x1] sm:$0x1] %v1800_v60 }
 0x292 PF: > { %p2088_p12 = scmp.ne.s32.totalorder %s2565_s16, 1 }
 0x293   : > { %s1806_s30 = smul.u32 (!%p2088_p12), 144, %s2561_s15 }
 0x294   : > { %1805 = sbr.rel (%p2088_p12) target bundleno = 692 (0x2b4), region = 52 }
 0x295   : > { %s3786_s5 = scalar_lea.vmem (!%p2088_p12), [#allocation2], %s1806_s30 }
 0x299   : > { %v3782_v39 = vld [vmem:[#allocation4] ss:$0 sm:$0xff]  ;;  %v3784_v57 = vld [vmem:[#allocation4 + $0x1] ss:$0 sm:$0xff]  ;;  %v1809_v22 = vld [vmem:[%s3786_s5 + $0x8] sm:$0xff] }
 0x29a   : > { %v1808_v43 = vld [vmem:[%s3786_s5] sm:$0xff]  ;;  %v1873_v53 = vld [vmem:[%s2651_s26 + $0x8] sm:$0xff]  ;;  %v1810_v21 = vld [vmem:[%s3786_s5 + $0x10] sm:$0xff]  ;;  %v1832_v13 = vmul.f32 %v3782_v39, %v1809_v22 }
 0x29b   : > { %v1872_v33 = vld [vmem:[%s2651_s26] sm:$0xff]  ;;  %v1831_v36 = vmul.f32 %v3782_v39, %v1808_v43  ;;  %v1833_v16 = vmul.f32 %v3782_v39, %v1810_v21  ;;  %v1811_v40 = vld [vmem:[%s3786_s5 + $0x18] sm:$0xff]  ;;  %v1813_v30 = vld [vmem:[%s3786_s5 + $0x28] sm:$0xff] }
 0x29c   : > { %v1812_v54 = vld [vmem:[%s3786_s5 + $0x20] sm:$0xff]  ;;  %v1874_v56 = vld [vmem:[%s2651_s26 + $0x10] sm:$0xff]  ;;  %v1834_v49 = vmul.f32 %v3782_v39, %v1811_v40  ;;  %v1836_v47 = vmul.f32 %v3782_v39, %v1813_v30  ;;  %v1815_v3 = vld [vmem:[%s3786_s5 + $0x38] sm:$0xff]  ;;  %v1855_v41 = vadd.f32 %v3784_v57, %v1832_v13 }
 0x29d   : > { %v1835_v42 = vmul.f32 %v3782_v39, %v1812_v54  ;;  %v1814_v50 = vld [vmem:[%s3786_s5 + $0x30] sm:$0xff]  ;;  %v1854_v38 = vadd.f32 %v3784_v57, %v1831_v36  ;;  %v1856_v1 = vadd.f32 %v3784_v57, %v1833_v16  ;;  %v1875_v35 = vld [vmem:[%s2651_s26 + $0x18] sm:$0xff]  ;;  %v1876_v4 = vld [vmem:[%s2651_s26 + $0x20] sm:$0xff]  ;;  %v1838_v7 = vmul.f32 %v3782_v39, %v1815_v3 }
 0x29e   : > { %v1877_v2 = vld [vmem:[%s2651_s26 + $0x28] sm:$0xff]  ;;  %v1837_v18 = vmul.f32 %v3782_v39, %v1814_v50  ;;  %v1857_v12 = vadd.f32 %v3784_v57, %v1834_v49  ;;  %v1859_v31 = vadd.f32 %v3784_v57, %v1836_v47  ;;  %v1878_v58 = vld [vmem:[%s2651_s26 + $0x30] sm:$0xff]  ;;  %v1891_v14 = vadd.f32 %v1873_v53, %v1855_v41  ;;  %v1879_v37 = vld [vmem:[%s2651_s26 + $0x38] sm:$0xff] }
 0x29f   : > { %v1858_v20 = vadd.f32 %v3784_v57, %v1835_v42  ;;  %v1890_v11 = vadd.f32 %v1872_v33, %v1854_v38  ;;  %v1892_v28 = vadd.f32 %v1874_v56, %v1856_v1  ;;  %v1861_v52 = vadd.f32 %v3784_v57, %v1838_v7  ;;  %v1816_v62 = vld [vmem:[%s3786_s5 + $0x40] sm:$0xff]  ;;  %v1817_v55 = vld [vmem:[%s3786_s5 + $0x48] sm:$0xff]  ;;  %v1818_v27 = vld [vmem:[%s3786_s5 + $0x50] sm:$0xff] }
 0x2a0   : > { %v1860_v8 = vadd.f32 %v3784_v57, %v1837_v18  ;;  %v1893_v59 = vadd.f32 %v1875_v35, %v1857_v12  ;;  %v1895_v10 = vadd.f32 %v1877_v2, %v1859_v31  ;;  %v1909_v61 = vmax.f32 %v1891_v14, 0.0  ;;  %v1819_v45 = vld [vmem:[%s3786_s5 + $0x58] sm:$0xff]  ;;  %v1820_v0 = vld [vmem:[%s3786_s5 + $0x60] sm:$0xff]  ;;  %v1821_v48 = vld [vmem:[%s3786_s5 + $0x68] sm:$0xff] }
 0x2a1   : > { %v1894_v15 = vadd.f32 %v1876_v4, %v1858_v20  ;;  %v1908_v51 = vmax.f32 %v1890_v11, 0.0  ;;  %v1910_v29 = vmax.f32 %v1892_v28, 0.0  ;;  %v1897_v63 = vadd.f32 %v1879_v37, %v1861_v52  ;;  %v1822_v46 = vld [vmem:[%s3786_s5 + $0x70] sm:$0xff]  ;;  %v1823_v17 = vld [vmem:[%s3786_s5 + $0x78] sm:$0xff]  ;;  %v1880_v6 = vld [vmem:[%s2651_s26 + $0x40] sm:$0xff] }
 0x2a2   : > { %v1896_v26 = vadd.f32 %v1878_v58, %v1860_v8  ;;  %v1911_v32 = vmax.f32 %v1893_v59, 0.0  ;;  %v1913_v24 = vmax.f32 %v1895_v10, 0.0  ;;  %1927 = vst [vmem:[%s2656_s29 + $0x8] sm:$0xff] %v1909_v61  ;;  %v1839_v19 = vmul.f32 %v3782_v39, %v1816_v62  ;;  %v1881_v5 = vld [vmem:[%s2651_s26 + $0x48] sm:$0xff]  ;;  %v1882_v60 = vld [vmem:[%s2651_s26 + $0x50] sm:$0xff]  ;;  %v1883_v13 = vld [vmem:[%s2651_s26 + $0x58] sm:$0xff] }
 0x2a3   : > { %v1912_v34 = vmax.f32 %v1894_v15, 0.0  ;;  %1926 = vst [vmem:[%s2656_s29] sm:$0xff] %v1908_v51  ;;  %1928 = vst [vmem:[%s2656_s29 + $0x10] sm:$0xff] %v1910_v29  ;;  %v1840_v25 = vmul.f32 %v3782_v39, %v1817_v55  ;;  %v1841_v9 = vmul.f32 %v3782_v39, %v1818_v27  ;;  %v1915_v44 = vmax.f32 %v1897_v63, 0.0  ;;  %v1884_v16 = vld [vmem:[%s2651_s26 + $0x60] sm:$0xff]  ;;  %v1885_v40 = vld [vmem:[%s2651_s26 + $0x68] sm:$0xff] }
 0x2a4   : > { %v1914_v23 = vmax.f32 %v1896_v26, 0.0  ;;  %1929 = vst [vmem:[%s2656_s29 + $0x18] sm:$0xff] %v1911_v32  ;;  %1931 = vst [vmem:[%s2656_s29 + $0x28] sm:$0xff] %v1913_v24  ;;  %v1842_v43 = vmul.f32 %v3782_v39, %v1819_v45  ;;  %v1843_v33 = vmul.f32 %v3782_v39, %v1820_v0  ;;  %v1844_v22 = vmul.f32 %v3782_v39, %v1821_v48  ;;  %v1886_v42 = vld [vmem:[%s2651_s26 + $0x70] sm:$0xff]  ;;  %v1887_v1 = vld [vmem:[%s2651_s26 + $0x78] sm:$0xff] }
 0x2a5   : > { %1930 = vst [vmem:[%s2656_s29 + $0x20] sm:$0xff] %v1912_v34  ;;  %v1862_v53 = vadd.f32 %v3784_v57, %v1839_v19  ;;  %v1863_v21 = vadd.f32 %v3784_v57, %v1840_v25  ;;  %v1864_v36 = vadd.f32 %v3784_v57, %v1841_v9  ;;  %v1845_v54 = vmul.f32 %v3782_v39, %v1822_v46  ;;  %v1824_v12 = vld [vmem:[%s3786_s5 + $0x80] sm:$0xff]  ;;  %v1825_v20 = vld [vmem:[%s3786_s5 + $0x88] sm:$0xff] }
 0x2a6   : > { %1932 = vst [vmem:[%s2656_s29 + $0x30] sm:$0xff] %v1914_v23  ;;  %1933 = vst [vmem:[%s2656_s29 + $0x38] sm:$0xff] %v1915_v44  ;;  %v1865_v30 = vadd.f32 %v3784_v57, %v1842_v43  ;;  %v1866_v56 = vadd.f32 %v3784_v57, %v1843_v33  ;;  %v1867_v49 = vadd.f32 %v3784_v57, %v1844_v22  ;;  %v1888_v62 = vld [vmem:[%s2651_s26 + $0x80] sm:$0xff]  ;;  %v1889_v55 = vld [vmem:[%s2651_s26 + $0x88] sm:$0xff] }
 0x2a7   : > { %v1846_v47 = vmul.f32 %v3782_v39, %v1823_v17  ;;  %v1898_v50 = vadd.f32 %v1880_v6, %v1862_v53  ;;  %v1899_v3 = vadd.f32 %v1881_v5, %v1863_v21  ;;  %v1900_v38 = vadd.f32 %v1882_v60, %v1864_v36 }
 0x2a8   : > { %v1868_v41 = vadd.f32 %v3784_v57, %v1845_v54  ;;  %v1901_v35 = vadd.f32 %v1883_v13, %v1865_v30  ;;  %v1902_v4 = vadd.f32 %v1884_v16, %v1866_v56  ;;  %v1903_v2 = vadd.f32 %v1885_v40, %v1867_v49 }
 0x2a9   : > { %v1869_v18 = vadd.f32 %v3784_v57, %v1846_v47  ;;  %v1916_v31 = vmax.f32 %v1898_v50, 0.0  ;;  %v1917_v58 = vmax.f32 %v1899_v3, 0.0  ;;  %v1918_v7 = vmax.f32 %v1900_v38, 0.0 }
 0x2aa   : > { %v1904_v11 = vadd.f32 %v1886_v42, %v1868_v41  ;;  %v1919_v14 = vmax.f32 %v1901_v35, 0.0  ;;  %v1920_v28 = vmax.f32 %v1902_v4, 0.0  ;;  %v1921_v8 = vmax.f32 %v1903_v2, 0.0 }
 0x2ab   : > { %v1905_v37 = vadd.f32 %v1887_v1, %v1869_v18  ;;  %1934 = vst [vmem:[%s2656_s29 + $0x40] sm:$0xff] %v1916_v31  ;;  %1935 = vst [vmem:[%s2656_s29 + $0x48] sm:$0xff] %v1917_v58  ;;  %v1847_v15 = vmul.f32 %v3782_v39, %v1824_v12  ;;  %v1848_v10 = vmul.f32 %v3782_v39, %v1825_v20 }
 0x2ac   : > { %1936 = vst [vmem:[%s2656_s29 + $0x50] sm:$0xff] %v1918_v7  ;;  %v1922_v59 = vmax.f32 %v1904_v11, 0.0  ;;  %1937 = vst [vmem:[%s2656_s29 + $0x58] sm:$0xff] %v1919_v14 }
 0x2ad   : > { %1938 = vst [vmem:[%s2656_s29 + $0x60] sm:$0xff] %v1920_v28  ;;  %1939 = vst [vmem:[%s2656_s29 + $0x68] sm:$0xff] %v1921_v8  ;;  %v1923_v52 = vmax.f32 %v1905_v37, 0.0  ;;  %v1870_v27 = vadd.f32 %v3784_v57, %v1847_v15  ;;  %v1871_v51 = vadd.f32 %v3784_v57, %v1848_v10 }
 0x2ae   : > { %1940 = vst [vmem:[%s2656_s29 + $0x70] sm:$0xff] %v1922_v59 }
 0x2af   : > { %1941 = vst [vmem:[%s2656_s29 + $0x78] sm:$0xff] %v1923_v52  ;;  %v1906_v61 = vadd.f32 %v1888_v62, %v1870_v27  ;;  %v1907_v29 = vadd.f32 %v1889_v55, %v1871_v51 }
 0x2b1   : > { %v1924_v26 = vmax.f32 %v1906_v61, 0.0  ;;  %v1925_v45 = vmax.f32 %v1907_v29, 0.0 }
 0x2b3   : > { %1942 = vst [vmem:[%s2656_s29 + $0x80] sm:$0xff] %v1924_v26  ;;  %1943 = vst [vmem:[%s2656_s29 + $0x88] sm:$0xff] %v1925_v45 }
 0x2b4 PF: > { %s14_s19 = sadd.s32 1, %s2577_s19   ;;  %s3970_s15 = smov %s2569_s17 }
 0x2b5   : > { %p11_p13 = scmp.ge.s32.totalorder %s14_s19, 6   ;;  %s3971_s16 = smov %s2573_s18 }
 0x2b6   : > { %s3972_s17 = smov %s3975_s20  ;;  %s3973_s18 = smov %s3979_s21 }
 0x2b7   :  { %13 = sbr.rel (!%p11_p13) target bundleno = 3 (0x3), region = 86 }

</bundles_post_ra>
